<compile_context>
chip_gen: v7x
topology: tpu7x:2x2x1
jax: 0.10.0
libtpu: 0.0.40
codegen_flags: <defaults>
</compile_context>

<pallas_src>
import math

import jax
import jax.numpy as jnp
from jax.experimental import pallas as pl
from jax.experimental.pallas import tpu as pltpu


def _vmem():
    # Whole-array block resident in VMEM (single kernel invocation, no grid).
    return pl.BlockSpec(memory_space=pltpu.MemorySpace.VMEM)


# ------------------------------ fused kernel ---------------------------------

def _make_fused_kernel(B, T, H, num_layers):
    L = num_layers

    def kernel(*refs):
        # refs = x, we, be, [wi, bi, wh, bhn] * L, o_ref, y_scr
        x_ref, we_ref, be_ref = refs[0], refs[1], refs[2]
        layer_refs = refs[3:3 + 4 * L]
        o_ref = refs[3 + 4 * L]
        y_scr = refs[3 + 4 * L + 1]

        # ---- off-serial-path GEMMs (all timesteps at once, M = B*T) --------
        x = x_ref[...].reshape(B * T, x_ref.shape[-1])        # batch-major rows
        e = jnp.dot(x, we_ref[...], preferred_element_type=jnp.float32)
        prev = jnp.maximum(e + be_ref[...], 0.0)              # embed + ReLU

        for l in range(L):
            wi = layer_refs[4 * l][...]        # (F, 3H)  gates packed r|z|n
            bi = layer_refs[4 * l + 1][...]    # (1, 3H)  bh_r/bh_z pre-folded
            wh = layer_refs[4 * l + 2][...]    # (H, 3H)
            bhn = layer_refs[4 * l + 3][...]   # (1, H)   hidden bias of n gate

            # input-side gates for every timestep: one MXU GEMM
            gx = jnp.dot(prev, wi, preferred_element_type=jnp.float32) + bi
            gx = gx.reshape(B, T, 3 * H)

            tgt = o_ref if l == L - 1 else y_scr               # (B, T, H) ref
            h = jnp.zeros((B, H), jnp.float32)
            # T is small & static -> fully unrolled serial recurrence; only one
            # tiny hidden-side matmul + VPU/EUP gate math per step.
            for t in range(T):
                gxt = gx[:, t, :]                              # (B, 3H)
                gh = jnp.dot(h, wh, preferred_element_type=jnp.float32)
                rz = jax.nn.sigmoid(gxt[:, :2 * H] + gh[:, :2 * H])  # 1 EUP pass
                r = rz[:, :H]
                z = rz[:, H:]
                n = jnp.tanh(gxt[:, 2 * H:] + r * (gh[:, 2 * H:] + bhn))
                h = n + z * (h - n)            # == (1-z)*n + z*h (PyTorch GRU)
                tgt[:, pl.ds(t, 1), :] = h[:, None, :].astype(tgt.dtype)
            if l + 1 < L:
                prev = y_scr[...].reshape(B * T, H)

    return kernel


def gru_model_forward(x_bf, packed):
    # x_bf: (B, T, input_size), batch-first like the PyTorch module.
    B, T, _ = x_bf.shape
    layers = packed["layers"]
    L = len(layers)
    H = layers[0]["wh"].shape[0]

    inputs = [x_bf, packed["embed_w"], packed["embed_b"]]
    for layer in layers:
        inputs += [layer["wi"], layer["bi"], layer["wh"], layer["bhn"]]

    kernel = _make_fused_kernel(B, T, H, L)
    return pl.pallas_call(
        kernel,
        out_shape=jax.ShapeDtypeStruct((B, T, H), jnp.float32),
        in_specs=[_vmem()] * len(inputs),
        out_specs=_vmem(),
        scratch_shapes=[pltpu.VMEM((B, T, H), jnp.float32)],  # inter-layer slab
    )(*inputs)
    # TODO(synk): has_output=True head (Linear-ReLU-Linear) not built since the
    #             module default is has_output=False.


# --------------------------- deterministic params ----------------------------

def _xavier_uniform(key, shape_out_in, gain):
    fan_out, fan_in = shape_out_in
    bound = gain * math.sqrt(6.0 / (fan_in + fan_out))
    return jax.random.uniform(key, shape_out_in, jnp.float32, -bound, bound)


def init_params(key, input_size, embedding_size, hidden_size, num_layers):
    keys = jax.random.split(key, 2 + 2 * num_layers)
    gain_relu = math.sqrt(2.0)     # nn.init.calculate_gain('relu')
    gain_sigmoid = 1.0             # nn.init.calculate_gain('sigmoid')
    H = hidden_size

    # embed = nn.Linear(input_size, embedding_size); weight xavier(gain=relu)
    w_embed = _xavier_uniform(keys[0], (embedding_size, input_size), gain_relu)
    lim = 1.0 / math.sqrt(input_size)
    b_embed = jax.random.uniform(keys[1], (1, embedding_size), jnp.float32,
                                 -lim, lim)

    layers = []
    for l in range(num_layers):
        in_f = embedding_size if l == 0 else hidden_size
        # torch layout: weight_ih_l{k} (3H, in_f), weight_hh_l{k} (3H, H);
        # gate rows ordered r, z, n.  Pack as (in_f, 3H) / (H, 3H).
        w_ih = _xavier_uniform(keys[2 + 2 * l], (3 * H, in_f), gain_sigmoid)
        w_hh = _xavier_uniform(keys[3 + 2 * l], (3 * H, H), gain_sigmoid)
        layers.append({
            "wi": w_ih.T,                                     # (in_f, 3H)
            "wh": w_hh.T,                                     # (H, 3H)
            "bi": jnp.full((1, 3 * H), 0.25, jnp.float32),    # constant_(0.25)
            "bh": jnp.full((1, 3 * H), 0.25, jnp.float32),
        })

    return {"embed_w": w_embed.T, "embed_b": b_embed, "gru_layers": layers}


def pack_for_kernel(params):
    # One-time parameter transform: fold bh_r / bh_z into the input-side gate
    # bias (they are purely additive there), keep only bh_n for the recurrence.
    layers = []
    for layer in params["gru_layers"]:
        H = layer["wh"].shape[0]
        bi, bh = layer["bi"], layer["bh"]
        bi_folded = jnp.concatenate(
            [bi[:, :2 * H] + bh[:, :2 * H], bi[:, 2 * H:]], axis=1)
        layers.append({
            "wi": layer["wi"],
            "bi": bi_folded,                  # (1, 3H)
            "wh": layer["wh"],
            "bhn": bh[:, 2 * H:],             # (1, H)
        })
    return {"embed_w": params["embed_w"], "embed_b": params["embed_b"],
            "layers": layers}


# --------------------------- pure-JAX reference -------------------------------

def reference_forward(x_bf, params):
    h = jnp.maximum(jnp.einsum("bti,ie->bte", x_bf, params["embed_w"])
                    + params["embed_b"][0], 0.0)
    for layer in params["gru_layers"]:
        wi, wh, bi, bh = layer["wi"], layer["wh"], layer["bi"], layer["bh"]
        H = wh.shape[0]
        B = h.shape[0]
        state = jnp.zeros((B, H), jnp.float32)

        def step(state, x_t):
            gx = x_t @ wi + bi[0]
            gh = state @ wh + bh[0]
            r = jax.nn.sigmoid(gx[:, :H] + gh[:, :H])
            z = jax.nn.sigmoid(gx[:, H:2 * H] + gh[:, H:2 * H])
            n = jnp.tanh(gx[:, 2 * H:] + r * gh[:, 2 * H:])
            new = (1.0 - z) * n + z * state
            return new, new

        _, outs = jax.lax.scan(step, state, jnp.transpose(h, (1, 0, 2)))
        h = jnp.transpose(outs, (1, 0, 2))
    return h


# --------------------------- main --------------------------------------------

if __name__ == "__main__":
    B, T = 2, 8
    input_size, embedding_size, hidden_size, num_layers = 4, 16, 32, 2

    root = jax.random.PRNGKey(0)
    k_params, k_x = jax.random.split(root)
    params = init_params(k_params, input_size, embedding_size, hidden_size,
                         num_layers)
    packed = pack_for_kernel(params)
    x = jax.random.normal(k_x, (B, T, input_size), jnp.float32)

    fwd = jax.jit(gru_model_forward)
    out = jax.block_until_ready(fwd(x, packed))
    assert out.shape == (B, T, hidden_size), out.shape

    ref = jax.block_until_ready(reference_forward(x, params))
    assert jnp.allclose(out, ref, atol=1e-4, rtol=1e-4), \
        float(jnp.max(jnp.abs(out - ref)))

    print("KERNEL_OK")
</pallas_src>

<mosaic_0001>
module attributes {stable_mosaic.version = 11 : i64} {
  func.func @kernel(%arg0: memref<2x8x4xf32, #tpu.memory_space<vmem>>, %arg1: memref<4x16xf32, #tpu.memory_space<vmem>>, %arg2: memref<1x16xf32, #tpu.memory_space<vmem>>, %arg3: memref<16x96xf32, #tpu.memory_space<vmem>>, %arg4: memref<1x96xf32, #tpu.memory_space<vmem>>, %arg5: memref<32x96xf32, #tpu.memory_space<vmem>>, %arg6: memref<1x32xf32, #tpu.memory_space<vmem>>, %arg7: memref<32x96xf32, #tpu.memory_space<vmem>>, %arg8: memref<1x96xf32, #tpu.memory_space<vmem>>, %arg9: memref<32x96xf32, #tpu.memory_space<vmem>>, %arg10: memref<1x32xf32, #tpu.memory_space<vmem>>, %arg11: memref<2x8x32xf32, #tpu.memory_space<vmem>>, %arg12: memref<2x8x32xf32, #tpu.memory_space<vmem>>) attributes {dimension_semantics = [], scalar_prefetch = 0 : i64, scratch_operands = 1 : i64, tpu.core_type = #tpu.core_type<tc>} {
    %c0 = arith.constant 0 : index
    %c0_0 = arith.constant 0 : index
    %c0_1 = arith.constant 0 : index
    %0 = vector.load %arg0[%c0, %c0_0, %c0_1] : memref<2x8x4xf32, #tpu.memory_space<vmem>>, vector<2x8x4xf32>
    %1 = vector.shape_cast %0 : vector<2x8x4xf32> to vector<16x4xf32>
    %c0_2 = arith.constant 0 : index
    %c0_3 = arith.constant 0 : index
    %2 = vector.load %arg1[%c0_2, %c0_3] : memref<4x16xf32, #tpu.memory_space<vmem>>, vector<4x16xf32>
    %cst = arith.constant dense<0.000000e+00> : vector<16x16xf32>
    %3 = tpu.matmul %1, %2, %cst {dimension_numbers = #tpu.dot_dimension_numbers<[1], [0], [0], [1], [0, 0, 1, 1], [], []>} : vector<16x4xf32>, vector<4x16xf32>, vector<16x16xf32> -> vector<16x16xf32>
    %c0_4 = arith.constant 0 : index
    %c0_5 = arith.constant 0 : index
    %4 = vector.load %arg2[%c0_4, %c0_5] : memref<1x16xf32, #tpu.memory_space<vmem>>, vector<1x16xf32>
    %5 = vector.broadcast %4 : vector<1x16xf32> to vector<16x16xf32>
    %6 = arith.addf %3, %5 : vector<16x16xf32>
    %cst_6 = arith.constant 0.000000e+00 : f32
    %7 = vector.broadcast %cst_6 : f32 to vector<16x16xf32>
    %8 = arith.maximumf %6, %7 : vector<16x16xf32>
    %c0_7 = arith.constant 0 : index
    %c0_8 = arith.constant 0 : index
    %9 = vector.load %arg3[%c0_7, %c0_8] : memref<16x96xf32, #tpu.memory_space<vmem>>, vector<16x96xf32>
    %c0_9 = arith.constant 0 : index
    %c0_10 = arith.constant 0 : index
    %10 = vector.load %arg4[%c0_9, %c0_10] : memref<1x96xf32, #tpu.memory_space<vmem>>, vector<1x96xf32>
    %c0_11 = arith.constant 0 : index
    %c0_12 = arith.constant 0 : index
    %11 = vector.load %arg5[%c0_11, %c0_12] : memref<32x96xf32, #tpu.memory_space<vmem>>, vector<32x96xf32>
    %c0_13 = arith.constant 0 : index
    %c0_14 = arith.constant 0 : index
    %12 = vector.load %arg6[%c0_13, %c0_14] : memref<1x32xf32, #tpu.memory_space<vmem>>, vector<1x32xf32>
    %cst_15 = arith.constant dense<0.000000e+00> : vector<16x96xf32>
    %13 = tpu.matmul %8, %9, %cst_15 {dimension_numbers = #tpu.dot_dimension_numbers<[1], [0], [0], [1], [0, 0, 1, 1], [], []>} : vector<16x16xf32>, vector<16x96xf32>, vector<16x96xf32> -> vector<16x96xf32>
    %14 = vector.broadcast %10 : vector<1x96xf32> to vector<16x96xf32>
    %15 = arith.addf %13, %14 : vector<16x96xf32>
    %16 = vector.shape_cast %15 : vector<16x96xf32> to vector<2x8x96xf32>
    %cst_16 = arith.constant 0.000000e+00 : f32
    %17 = vector.broadcast %cst_16 : f32 to vector<2x32xf32>
    %18 = vector.extract_strided_slice %16 {offsets = [0, 0, 0], sizes = [2, 1, 96], strides = [1, 1, 1]} : vector<2x8x96xf32> to vector<2x1x96xf32>
    %19 = vector.shape_cast %18 : vector<2x1x96xf32> to vector<2x96xf32>
    %cst_17 = arith.constant dense<0.000000e+00> : vector<2x96xf32>
    %20 = tpu.matmul %17, %11, %cst_17 {dimension_numbers = #tpu.dot_dimension_numbers<[1], [0], [0], [1], [0, 0, 1, 1], [], []>} : vector<2x32xf32>, vector<32x96xf32>, vector<2x96xf32> -> vector<2x96xf32>
    %21 = vector.extract_strided_slice %19 {offsets = [0, 0], sizes = [2, 64], strides = [1, 1]} : vector<2x96xf32> to vector<2x64xf32>
    %22 = vector.extract_strided_slice %20 {offsets = [0, 0], sizes = [2, 64], strides = [1, 1]} : vector<2x96xf32> to vector<2x64xf32>
    %23 = arith.addf %21, %22 : vector<2x64xf32>
    %24 = arith.negf %23 : vector<2x64xf32>
    %25 = math.exp %24 : vector<2x64xf32>
    %cst_18 = arith.constant 1.000000e+00 : f32
    %26 = vector.broadcast %cst_18 : f32 to vector<2x64xf32>
    %27 = arith.addf %26, %25 : vector<2x64xf32>
    %28 = arith.divf %26, %27 : vector<2x64xf32>
    %29 = vector.extract_strided_slice %28 {offsets = [0, 0], sizes = [2, 32], strides = [1, 1]} : vector<2x64xf32> to vector<2x32xf32>
    %30 = vector.extract_strided_slice %28 {offsets = [0, 32], sizes = [2, 32], strides = [1, 1]} : vector<2x64xf32> to vector<2x32xf32>
    %31 = vector.extract_strided_slice %19 {offsets = [0, 64], sizes = [2, 32], strides = [1, 1]} : vector<2x96xf32> to vector<2x32xf32>
    %32 = vector.extract_strided_slice %20 {offsets = [0, 64], sizes = [2, 32], strides = [1, 1]} : vector<2x96xf32> to vector<2x32xf32>
    %33 = vector.broadcast %12 : vector<1x32xf32> to vector<2x32xf32>
    %34 = arith.addf %32, %33 : vector<2x32xf32>
    %35 = arith.mulf %29, %34 : vector<2x32xf32>
    %36 = arith.addf %31, %35 : vector<2x32xf32>
    %37 = math.tanh %36 : vector<2x32xf32>
    %38 = arith.subf %17, %37 : vector<2x32xf32>
    %39 = arith.mulf %30, %38 : vector<2x32xf32>
    %40 = arith.addf %37, %39 : vector<2x32xf32>
    %41 = vector.shape_cast %40 : vector<2x32xf32> to vector<2x1x32xf32>
    %c0_19 = arith.constant 0 : index
    %c0_20 = arith.constant 0 : index
    %c0_21 = arith.constant 0 : index
    %42 = vector.load %arg12[%c0_19, %c0_20, %c0_21] : memref<2x8x32xf32, #tpu.memory_space<vmem>>, vector<2x1x32xf32>
    tpu.vector_store %arg12[%c0_19, %c0_20, %c0_21], %41 {strides = array<i32>} : memref<2x8x32xf32, #tpu.memory_space<vmem>>, vector<2x1x32xf32>,
    %43 = vector.extract_strided_slice %16 {offsets = [0, 1, 0], sizes = [2, 1, 96], strides = [1, 1, 1]} : vector<2x8x96xf32> to vector<2x1x96xf32>
    %44 = vector.shape_cast %43 : vector<2x1x96xf32> to vector<2x96xf32>
    %cst_22 = arith.constant dense<0.000000e+00> : vector<2x96xf32>
    %45 = tpu.matmul %40, %11, %cst_22 {dimension_numbers = #tpu.dot_dimension_numbers<[1], [0], [0], [1], [0, 0, 1, 1], [], []>} : vector<2x32xf32>, vector<32x96xf32>, vector<2x96xf32> -> vector<2x96xf32>
    %46 = vector.extract_strided_slice %44 {offsets = [0, 0], sizes = [2, 64], strides = [1, 1]} : vector<2x96xf32> to vector<2x64xf32>
    %47 = vector.extract_strided_slice %45 {offsets = [0, 0], sizes = [2, 64], strides = [1, 1]} : vector<2x96xf32> to vector<2x64xf32>
    %48 = arith.addf %46, %47 : vector<2x64xf32>
    %49 = arith.negf %48 : vector<2x64xf32>
    %50 = math.exp %49 : vector<2x64xf32>
    %cst_23 = arith.constant 1.000000e+00 : f32
    %51 = vector.broadcast %cst_23 : f32 to vector<2x64xf32>
    %52 = arith.addf %51, %50 : vector<2x64xf32>
    %53 = arith.divf %51, %52 : vector<2x64xf32>
    %54 = vector.extract_strided_slice %53 {offsets = [0, 0], sizes = [2, 32], strides = [1, 1]} : vector<2x64xf32> to vector<2x32xf32>
    %55 = vector.extract_strided_slice %53 {offsets = [0, 32], sizes = [2, 32], strides = [1, 1]} : vector<2x64xf32> to vector<2x32xf32>
    %56 = vector.extract_strided_slice %44 {offsets = [0, 64], sizes = [2, 32], strides = [1, 1]} : vector<2x96xf32> to vector<2x32xf32>
    %57 = vector.extract_strided_slice %45 {offsets = [0, 64], sizes = [2, 32], strides = [1, 1]} : vector<2x96xf32> to vector<2x32xf32>
    %58 = vector.broadcast %12 : vector<1x32xf32> to vector<2x32xf32>
    %59 = arith.addf %57, %58 : vector<2x32xf32>
    %60 = arith.mulf %54, %59 : vector<2x32xf32>
    %61 = arith.addf %56, %60 : vector<2x32xf32>
    %62 = math.tanh %61 : vector<2x32xf32>
    %63 = arith.subf %40, %62 : vector<2x32xf32>
    %64 = arith.mulf %55, %63 : vector<2x32xf32>
    %65 = arith.addf %62, %64 : vector<2x32xf32>
    %66 = vector.shape_cast %65 : vector<2x32xf32> to vector<2x1x32xf32>
    %c0_24 = arith.constant 0 : index
    %c1 = arith.constant 1 : index
    %c0_25 = arith.constant 0 : index
    %67 = vector.load %arg12[%c0_24, %c1, %c0_25] : memref<2x8x32xf32, #tpu.memory_space<vmem>>, vector<2x1x32xf32>
    tpu.vector_store %arg12[%c0_24, %c1, %c0_25], %66 {strides = array<i32>} : memref<2x8x32xf32, #tpu.memory_space<vmem>>, vector<2x1x32xf32>,
    %68 = vector.extract_strided_slice %16 {offsets = [0, 2, 0], sizes = [2, 1, 96], strides = [1, 1, 1]} : vector<2x8x96xf32> to vector<2x1x96xf32>
    %69 = vector.shape_cast %68 : vector<2x1x96xf32> to vector<2x96xf32>
    %cst_26 = arith.constant dense<0.000000e+00> : vector<2x96xf32>
    %70 = tpu.matmul %65, %11, %cst_26 {dimension_numbers = #tpu.dot_dimension_numbers<[1], [0], [0], [1], [0, 0, 1, 1], [], []>} : vector<2x32xf32>, vector<32x96xf32>, vector<2x96xf32> -> vector<2x96xf32>
    %71 = vector.extract_strided_slice %69 {offsets = [0, 0], sizes = [2, 64], strides = [1, 1]} : vector<2x96xf32> to vector<2x64xf32>
    %72 = vector.extract_strided_slice %70 {offsets = [0, 0], sizes = [2, 64], strides = [1, 1]} : vector<2x96xf32> to vector<2x64xf32>
    %73 = arith.addf %71, %72 : vector<2x64xf32>
    %74 = arith.negf %73 : vector<2x64xf32>
    %75 = math.exp %74 : vector<2x64xf32>
    %cst_27 = arith.constant 1.000000e+00 : f32
    %76 = vector.broadcast %cst_27 : f32 to vector<2x64xf32>
    %77 = arith.addf %76, %75 : vector<2x64xf32>
    %78 = arith.divf %76, %77 : vector<2x64xf32>
    %79 = vector.extract_strided_slice %78 {offsets = [0, 0], sizes = [2, 32], strides = [1, 1]} : vector<2x64xf32> to vector<2x32xf32>
    %80 = vector.extract_strided_slice %78 {offsets = [0, 32], sizes = [2, 32], strides = [1, 1]} : vector<2x64xf32> to vector<2x32xf32>
    %81 = vector.extract_strided_slice %69 {offsets = [0, 64], sizes = [2, 32], strides = [1, 1]} : vector<2x96xf32> to vector<2x32xf32>
    %82 = vector.extract_strided_slice %70 {offsets = [0, 64], sizes = [2, 32], strides = [1, 1]} : vector<2x96xf32> to vector<2x32xf32>
    %83 = vector.broadcast %12 : vector<1x32xf32> to vector<2x32xf32>
    %84 = arith.addf %82, %83 : vector<2x32xf32>
    %85 = arith.mulf %79, %84 : vector<2x32xf32>
    %86 = arith.addf %81, %85 : vector<2x32xf32>
    %87 = math.tanh %86 : vector<2x32xf32>
    %88 = arith.subf %65, %87 : vector<2x32xf32>
    %89 = arith.mulf %80, %88 : vector<2x32xf32>
    %90 = arith.addf %87, %89 : vector<2x32xf32>
    %91 = vector.shape_cast %90 : vector<2x32xf32> to vector<2x1x32xf32>
    %c0_28 = arith.constant 0 : index
    %c2 = arith.constant 2 : index
    %c0_29 = arith.constant 0 : index
    %92 = vector.load %arg12[%c0_28, %c2, %c0_29] : memref<2x8x32xf32, #tpu.memory_space<vmem>>, vector<2x1x32xf32>
    tpu.vector_store %arg12[%c0_28, %c2, %c0_29], %91 {strides = array<i32>} : memref<2x8x32xf32, #tpu.memory_space<vmem>>, vector<2x1x32xf32>,
    %93 = vector.extract_strided_slice %16 {offsets = [0, 3, 0], sizes = [2, 1, 96], strides = [1, 1, 1]} : vector<2x8x96xf32> to vector<2x1x96xf32>
    %94 = vector.shape_cast %93 : vector<2x1x96xf32> to vector<2x96xf32>
    %cst_30 = arith.constant dense<0.000000e+00> : vector<2x96xf32>
    %95 = tpu.matmul %90, %11, %cst_30 {dimension_numbers = #tpu.dot_dimension_numbers<[1], [0], [0], [1], [0, 0, 1, 1], [], []>} : vector<2x32xf32>, vector<32x96xf32>, vector<2x96xf32> -> vector<2x96xf32>
    %96 = vector.extract_strided_slice %94 {offsets = [0, 0], sizes = [2, 64], strides = [1, 1]} : vector<2x96xf32> to vector<2x64xf32>
    %97 = vector.extract_strided_slice %95 {offsets = [0, 0], sizes = [2, 64], strides = [1, 1]} : vector<2x96xf32> to vector<2x64xf32>
    %98 = arith.addf %96, %97 : vector<2x64xf32>
    %99 = arith.negf %98 : vector<2x64xf32>
    %100 = math.exp %99 : vector<2x64xf32>
    %cst_31 = arith.constant 1.000000e+00 : f32
    %101 = vector.broadcast %cst_31 : f32 to vector<2x64xf32>
    %102 = arith.addf %101, %100 : vector<2x64xf32>
    %103 = arith.divf %101, %102 : vector<2x64xf32>
    %104 = vector.extract_strided_slice %103 {offsets = [0, 0], sizes = [2, 32], strides = [1, 1]} : vector<2x64xf32> to vector<2x32xf32>
    %105 = vector.extract_strided_slice %103 {offsets = [0, 32], sizes = [2, 32], strides = [1, 1]} : vector<2x64xf32> to vector<2x32xf32>
    %106 = vector.extract_strided_slice %94 {offsets = [0, 64], sizes = [2, 32], strides = [1, 1]} : vector<2x96xf32> to vector<2x32xf32>
    %107 = vector.extract_strided_slice %95 {offsets = [0, 64], sizes = [2, 32], strides = [1, 1]} : vector<2x96xf32> to vector<2x32xf32>
    %108 = vector.broadcast %12 : vector<1x32xf32> to vector<2x32xf32>
    %109 = arith.addf %107, %108 : vector<2x32xf32>
    %110 = arith.mulf %104, %109 : vector<2x32xf32>
    %111 = arith.addf %106, %110 : vector<2x32xf32>
    %112 = math.tanh %111 : vector<2x32xf32>
    %113 = arith.subf %90, %112 : vector<2x32xf32>
    %114 = arith.mulf %105, %113 : vector<2x32xf32>
    %115 = arith.addf %112, %114 : vector<2x32xf32>
    %116 = vector.shape_cast %115 : vector<2x32xf32> to vector<2x1x32xf32>
    %c0_32 = arith.constant 0 : index
    %c3 = arith.constant 3 : index
    %c0_33 = arith.constant 0 : index
    %117 = vector.load %arg12[%c0_32, %c3, %c0_33] : memref<2x8x32xf32, #tpu.memory_space<vmem>>, vector<2x1x32xf32>
    tpu.vector_store %arg12[%c0_32, %c3, %c0_33], %116 {strides = array<i32>} : memref<2x8x32xf32, #tpu.memory_space<vmem>>, vector<2x1x32xf32>,
    %118 = vector.extract_strided_slice %16 {offsets = [0, 4, 0], sizes = [2, 1, 96], strides = [1, 1, 1]} : vector<2x8x96xf32> to vector<2x1x96xf32>
    %119 = vector.shape_cast %118 : vector<2x1x96xf32> to vector<2x96xf32>
    %cst_34 = arith.constant dense<0.000000e+00> : vector<2x96xf32>
    %120 = tpu.matmul %115, %11, %cst_34 {dimension_numbers = #tpu.dot_dimension_numbers<[1], [0], [0], [1], [0, 0, 1, 1], [], []>} : vector<2x32xf32>, vector<32x96xf32>, vector<2x96xf32> -> vector<2x96xf32>
    %121 = vector.extract_strided_slice %119 {offsets = [0, 0], sizes = [2, 64], strides = [1, 1]} : vector<2x96xf32> to vector<2x64xf32>
    %122 = vector.extract_strided_slice %120 {offsets = [0, 0], sizes = [2, 64], strides = [1, 1]} : vector<2x96xf32> to vector<2x64xf32>
    %123 = arith.addf %121, %122 : vector<2x64xf32>
    %124 = arith.negf %123 : vector<2x64xf32>
    %125 = math.exp %124 : vector<2x64xf32>
    %cst_35 = arith.constant 1.000000e+00 : f32
    %126 = vector.broadcast %cst_35 : f32 to vector<2x64xf32>
    %127 = arith.addf %126, %125 : vector<2x64xf32>
    %128 = arith.divf %126, %127 : vector<2x64xf32>
    %129 = vector.extract_strided_slice %128 {offsets = [0, 0], sizes = [2, 32], strides = [1, 1]} : vector<2x64xf32> to vector<2x32xf32>
    %130 = vector.extract_strided_slice %128 {offsets = [0, 32], sizes = [2, 32], strides = [1, 1]} : vector<2x64xf32> to vector<2x32xf32>
    %131 = vector.extract_strided_slice %119 {offsets = [0, 64], sizes = [2, 32], strides = [1, 1]} : vector<2x96xf32> to vector<2x32xf32>
    %132 = vector.extract_strided_slice %120 {offsets = [0, 64], sizes = [2, 32], strides = [1, 1]} : vector<2x96xf32> to vector<2x32xf32>
    %133 = vector.broadcast %12 : vector<1x32xf32> to vector<2x32xf32>
    %134 = arith.addf %132, %133 : vector<2x32xf32>
    %135 = arith.mulf %129, %134 : vector<2x32xf32>
    %136 = arith.addf %131, %135 : vector<2x32xf32>
    %137 = math.tanh %136 : vector<2x32xf32>
    %138 = arith.subf %115, %137 : vector<2x32xf32>
    %139 = arith.mulf %130, %138 : vector<2x32xf32>
    %140 = arith.addf %137, %139 : vector<2x32xf32>
    %141 = vector.shape_cast %140 : vector<2x32xf32> to vector<2x1x32xf32>
    %c0_36 = arith.constant 0 : index
    %c4 = arith.constant 4 : index
    %c0_37 = arith.constant 0 : index
    %142 = vector.load %arg12[%c0_36, %c4, %c0_37] : memref<2x8x32xf32, #tpu.memory_space<vmem>>, vector<2x1x32xf32>
    tpu.vector_store %arg12[%c0_36, %c4, %c0_37], %141 {strides = array<i32>} : memref<2x8x32xf32, #tpu.memory_space<vmem>>, vector<2x1x32xf32>,
    %143 = vector.extract_strided_slice %16 {offsets = [0, 5, 0], sizes = [2, 1, 96], strides = [1, 1, 1]} : vector<2x8x96xf32> to vector<2x1x96xf32>
    %144 = vector.shape_cast %143 : vector<2x1x96xf32> to vector<2x96xf32>
    %cst_38 = arith.constant dense<0.000000e+00> : vector<2x96xf32>
    %145 = tpu.matmul %140, %11, %cst_38 {dimension_numbers = #tpu.dot_dimension_numbers<[1], [0], [0], [1], [0, 0, 1, 1], [], []>} : vector<2x32xf32>, vector<32x96xf32>, vector<2x96xf32> -> vector<2x96xf32>
    %146 = vector.extract_strided_slice %144 {offsets = [0, 0], sizes = [2, 64], strides = [1, 1]} : vector<2x96xf32> to vector<2x64xf32>
    %147 = vector.extract_strided_slice %145 {offsets = [0, 0], sizes = [2, 64], strides = [1, 1]} : vector<2x96xf32> to vector<2x64xf32>
    %148 = arith.addf %146, %147 : vector<2x64xf32>
    %149 = arith.negf %148 : vector<2x64xf32>
    %150 = math.exp %149 : vector<2x64xf32>
    %cst_39 = arith.constant 1.000000e+00 : f32
    %151 = vector.broadcast %cst_39 : f32 to vector<2x64xf32>
    %152 = arith.addf %151, %150 : vector<2x64xf32>
    %153 = arith.divf %151, %152 : vector<2x64xf32>
    %154 = vector.extract_strided_slice %153 {offsets = [0, 0], sizes = [2, 32], strides = [1, 1]} : vector<2x64xf32> to vector<2x32xf32>
    %155 = vector.extract_strided_slice %153 {offsets = [0, 32], sizes = [2, 32], strides = [1, 1]} : vector<2x64xf32> to vector<2x32xf32>
    %156 = vector.extract_strided_slice %144 {offsets = [0, 64], sizes = [2, 32], strides = [1, 1]} : vector<2x96xf32> to vector<2x32xf32>
    %157 = vector.extract_strided_slice %145 {offsets = [0, 64], sizes = [2, 32], strides = [1, 1]} : vector<2x96xf32> to vector<2x32xf32>
    %158 = vector.broadcast %12 : vector<1x32xf32> to vector<2x32xf32>
    %159 = arith.addf %157, %158 : vector<2x32xf32>
    %160 = arith.mulf %154, %159 : vector<2x32xf32>
    %161 = arith.addf %156, %160 : vector<2x32xf32>
    %162 = math.tanh %161 : vector<2x32xf32>
    %163 = arith.subf %140, %162 : vector<2x32xf32>
    %164 = arith.mulf %155, %163 : vector<2x32xf32>
    %165 = arith.addf %162, %164 : vector<2x32xf32>
    %166 = vector.shape_cast %165 : vector<2x32xf32> to vector<2x1x32xf32>
    %c0_40 = arith.constant 0 : index
    %c5 = arith.constant 5 : index
    %c0_41 = arith.constant 0 : index
    %167 = vector.load %arg12[%c0_40, %c5, %c0_41] : memref<2x8x32xf32, #tpu.memory_space<vmem>>, vector<2x1x32xf32>
    tpu.vector_store %arg12[%c0_40, %c5, %c0_41], %166 {strides = array<i32>} : memref<2x8x32xf32, #tpu.memory_space<vmem>>, vector<2x1x32xf32>,
    %168 = vector.extract_strided_slice %16 {offsets = [0, 6, 0], sizes = [2, 1, 96], strides = [1, 1, 1]} : vector<2x8x96xf32> to vector<2x1x96xf32>
    %169 = vector.shape_cast %168 : vector<2x1x96xf32> to vector<2x96xf32>
    %cst_42 = arith.constant dense<0.000000e+00> : vector<2x96xf32>
    %170 = tpu.matmul %165, %11, %cst_42 {dimension_numbers = #tpu.dot_dimension_numbers<[1], [0], [0], [1], [0, 0, 1, 1], [], []>} : vector<2x32xf32>, vector<32x96xf32>, vector<2x96xf32> -> vector<2x96xf32>
    %171 = vector.extract_strided_slice %169 {offsets = [0, 0], sizes = [2, 64], strides = [1, 1]} : vector<2x96xf32> to vector<2x64xf32>
    %172 = vector.extract_strided_slice %170 {offsets = [0, 0], sizes = [2, 64], strides = [1, 1]} : vector<2x96xf32> to vector<2x64xf32>
    %173 = arith.addf %171, %172 : vector<2x64xf32>
    %174 = arith.negf %173 : vector<2x64xf32>
    %175 = math.exp %174 : vector<2x64xf32>
    %cst_43 = arith.constant 1.000000e+00 : f32
    %176 = vector.broadcast %cst_43 : f32 to vector<2x64xf32>
    %177 = arith.addf %176, %175 : vector<2x64xf32>
    %178 = arith.divf %176, %177 : vector<2x64xf32>
    %179 = vector.extract_strided_slice %178 {offsets = [0, 0], sizes = [2, 32], strides = [1, 1]} : vector<2x64xf32> to vector<2x32xf32>
    %180 = vector.extract_strided_slice %178 {offsets = [0, 32], sizes = [2, 32], strides = [1, 1]} : vector<2x64xf32> to vector<2x32xf32>
    %181 = vector.extract_strided_slice %169 {offsets = [0, 64], sizes = [2, 32], strides = [1, 1]} : vector<2x96xf32> to vector<2x32xf32>
    %182 = vector.extract_strided_slice %170 {offsets = [0, 64], sizes = [2, 32], strides = [1, 1]} : vector<2x96xf32> to vector<2x32xf32>
    %183 = vector.broadcast %12 : vector<1x32xf32> to vector<2x32xf32>
    %184 = arith.addf %182, %183 : vector<2x32xf32>
    %185 = arith.mulf %179, %184 : vector<2x32xf32>
    %186 = arith.addf %181, %185 : vector<2x32xf32>
    %187 = math.tanh %186 : vector<2x32xf32>
    %188 = arith.subf %165, %187 : vector<2x32xf32>
    %189 = arith.mulf %180, %188 : vector<2x32xf32>
    %190 = arith.addf %187, %189 : vector<2x32xf32>
    %191 = vector.shape_cast %190 : vector<2x32xf32> to vector<2x1x32xf32>
    %c0_44 = arith.constant 0 : index
    %c6 = arith.constant 6 : index
    %c0_45 = arith.constant 0 : index
    %192 = vector.load %arg12[%c0_44, %c6, %c0_45] : memref<2x8x32xf32, #tpu.memory_space<vmem>>, vector<2x1x32xf32>
    tpu.vector_store %arg12[%c0_44, %c6, %c0_45], %191 {strides = array<i32>} : memref<2x8x32xf32, #tpu.memory_space<vmem>>, vector<2x1x32xf32>,
    %193 = vector.extract_strided_slice %16 {offsets = [0, 7, 0], sizes = [2, 1, 96], strides = [1, 1, 1]} : vector<2x8x96xf32> to vector<2x1x96xf32>
    %194 = vector.shape_cast %193 : vector<2x1x96xf32> to vector<2x96xf32>
    %cst_46 = arith.constant dense<0.000000e+00> : vector<2x96xf32>
    %195 = tpu.matmul %190, %11, %cst_46 {dimension_numbers = #tpu.dot_dimension_numbers<[1], [0], [0], [1], [0, 0, 1, 1], [], []>} : vector<2x32xf32>, vector<32x96xf32>, vector<2x96xf32> -> vector<2x96xf32>
    %196 = vector.extract_strided_slice %194 {offsets = [0, 0], sizes = [2, 64], strides = [1, 1]} : vector<2x96xf32> to vector<2x64xf32>
    %197 = vector.extract_strided_slice %195 {offsets = [0, 0], sizes = [2, 64], strides = [1, 1]} : vector<2x96xf32> to vector<2x64xf32>
    %198 = arith.addf %196, %197 : vector<2x64xf32>
    %199 = arith.negf %198 : vector<2x64xf32>
    %200 = math.exp %199 : vector<2x64xf32>
    %cst_47 = arith.constant 1.000000e+00 : f32
    %201 = vector.broadcast %cst_47 : f32 to vector<2x64xf32>
    %202 = arith.addf %201, %200 : vector<2x64xf32>
    %203 = arith.divf %201, %202 : vector<2x64xf32>
    %204 = vector.extract_strided_slice %203 {offsets = [0, 0], sizes = [2, 32], strides = [1, 1]} : vector<2x64xf32> to vector<2x32xf32>
    %205 = vector.extract_strided_slice %203 {offsets = [0, 32], sizes = [2, 32], strides = [1, 1]} : vector<2x64xf32> to vector<2x32xf32>
    %206 = vector.extract_strided_slice %194 {offsets = [0, 64], sizes = [2, 32], strides = [1, 1]} : vector<2x96xf32> to vector<2x32xf32>
    %207 = vector.extract_strided_slice %195 {offsets = [0, 64], sizes = [2, 32], strides = [1, 1]} : vector<2x96xf32> to vector<2x32xf32>
    %208 = vector.broadcast %12 : vector<1x32xf32> to vector<2x32xf32>
    %209 = arith.addf %207, %208 : vector<2x32xf32>
    %210 = arith.mulf %204, %209 : vector<2x32xf32>
    %211 = arith.addf %206, %210 : vector<2x32xf32>
    %212 = math.tanh %211 : vector<2x32xf32>
    %213 = arith.subf %190, %212 : vector<2x32xf32>
    %214 = arith.mulf %205, %213 : vector<2x32xf32>
    %215 = arith.addf %212, %214 : vector<2x32xf32>
    %216 = vector.shape_cast %215 : vector<2x32xf32> to vector<2x1x32xf32>
    %c0_48 = arith.constant 0 : index
    %c7 = arith.constant 7 : index
    %c0_49 = arith.constant 0 : index
    %217 = vector.load %arg12[%c0_48, %c7, %c0_49] : memref<2x8x32xf32, #tpu.memory_space<vmem>>, vector<2x1x32xf32>
    tpu.vector_store %arg12[%c0_48, %c7, %c0_49], %216 {strides = array<i32>} : memref<2x8x32xf32, #tpu.memory_space<vmem>>, vector<2x1x32xf32>,
    %c0_50 = arith.constant 0 : index
    %c0_51 = arith.constant 0 : index
    %c0_52 = arith.constant 0 : index
    %218 = vector.load %arg12[%c0_50, %c0_51, %c0_52] : memref<2x8x32xf32, #tpu.memory_space<vmem>>, vector<2x8x32xf32>
    %219 = vector.shape_cast %218 : vector<2x8x32xf32> to vector<16x32xf32>
    %c0_53 = arith.constant 0 : index
    %c0_54 = arith.constant 0 : index
    %220 = vector.load %arg7[%c0_53, %c0_54] : memref<32x96xf32, #tpu.memory_space<vmem>>, vector<32x96xf32>
    %c0_55 = arith.constant 0 : index
    %c0_56 = arith.constant 0 : index
    %221 = vector.load %arg8[%c0_55, %c0_56] : memref<1x96xf32, #tpu.memory_space<vmem>>, vector<1x96xf32>
    %c0_57 = arith.constant 0 : index
    %c0_58 = arith.constant 0 : index
    %222 = vector.load %arg9[%c0_57, %c0_58] : memref<32x96xf32, #tpu.memory_space<vmem>>, vector<32x96xf32>
    %c0_59 = arith.constant 0 : index
    %c0_60 = arith.constant 0 : index
    %223 = vector.load %arg10[%c0_59, %c0_60] : memref<1x32xf32, #tpu.memory_space<vmem>>, vector<1x32xf32>
    %cst_61 = arith.constant dense<0.000000e+00> : vector<16x96xf32>
    %224 = tpu.matmul %219, %220, %cst_61 {dimension_numbers = #tpu.dot_dimension_numbers<[1], [0], [0], [1], [0, 0, 1, 1], [], []>} : vector<16x32xf32>, vector<32x96xf32>, vector<16x96xf32> -> vector<16x96xf32>
    %225 = vector.broadcast %221 : vector<1x96xf32> to vector<16x96xf32>
    %226 = arith.addf %224, %225 : vector<16x96xf32>
    %227 = vector.shape_cast %226 : vector<16x96xf32> to vector<2x8x96xf32>
    %cst_62 = arith.constant 0.000000e+00 : f32
    %228 = vector.broadcast %cst_62 : f32 to vector<2x32xf32>
    %229 = vector.extract_strided_slice %227 {offsets = [0, 0, 0], sizes = [2, 1, 96], strides = [1, 1, 1]} : vector<2x8x96xf32> to vector<2x1x96xf32>
    %230 = vector.shape_cast %229 : vector<2x1x96xf32> to vector<2x96xf32>
    %cst_63 = arith.constant dense<0.000000e+00> : vector<2x96xf32>
    %231 = tpu.matmul %228, %222, %cst_63 {dimension_numbers = #tpu.dot_dimension_numbers<[1], [0], [0], [1], [0, 0, 1, 1], [], []>} : vector<2x32xf32>, vector<32x96xf32>, vector<2x96xf32> -> vector<2x96xf32>
    %232 = vector.extract_strided_slice %230 {offsets = [0, 0], sizes = [2, 64], strides = [1, 1]} : vector<2x96xf32> to vector<2x64xf32>
    %233 = vector.extract_strided_slice %231 {offsets = [0, 0], sizes = [2, 64], strides = [1, 1]} : vector<2x96xf32> to vector<2x64xf32>
    %234 = arith.addf %232, %233 : vector<2x64xf32>
    %235 = arith.negf %234 : vector<2x64xf32>
    %236 = math.exp %235 : vector<2x64xf32>
    %cst_64 = arith.constant 1.000000e+00 : f32
    %237 = vector.broadcast %cst_64 : f32 to vector<2x64xf32>
    %238 = arith.addf %237, %236 : vector<2x64xf32>
    %239 = arith.divf %237, %238 : vector<2x64xf32>
    %240 = vector.extract_strided_slice %239 {offsets = [0, 0], sizes = [2, 32], strides = [1, 1]} : vector<2x64xf32> to vector<2x32xf32>
    %241 = vector.extract_strided_slice %239 {offsets = [0, 32], sizes = [2, 32], strides = [1, 1]} : vector<2x64xf32> to vector<2x32xf32>
    %242 = vector.extract_strided_slice %230 {offsets = [0, 64], sizes = [2, 32], strides = [1, 1]} : vector<2x96xf32> to vector<2x32xf32>
    %243 = vector.extract_strided_slice %231 {offsets = [0, 64], sizes = [2, 32], strides = [1, 1]} : vector<2x96xf32> to vector<2x32xf32>
    %244 = vector.broadcast %223 : vector<1x32xf32> to vector<2x32xf32>
    %245 = arith.addf %243, %244 : vector<2x32xf32>
    %246 = arith.mulf %240, %245 : vector<2x32xf32>
    %247 = arith.addf %242, %246 : vector<2x32xf32>
    %248 = math.tanh %247 : vector<2x32xf32>
    %249 = arith.subf %228, %248 : vector<2x32xf32>
    %250 = arith.mulf %241, %249 : vector<2x32xf32>
    %251 = arith.addf %248, %250 : vector<2x32xf32>
    %252 = vector.shape_cast %251 : vector<2x32xf32> to vector<2x1x32xf32>
    %c0_65 = arith.constant 0 : index
    %c0_66 = arith.constant 0 : index
    %c0_67 = arith.constant 0 : index
    %253 = vector.load %arg11[%c0_65, %c0_66, %c0_67] : memref<2x8x32xf32, #tpu.memory_space<vmem>>, vector<2x1x32xf32>
    tpu.vector_store %arg11[%c0_65, %c0_66, %c0_67], %252 {strides = array<i32>} : memref<2x8x32xf32, #tpu.memory_space<vmem>>, vector<2x1x32xf32>,
    %254 = vector.extract_strided_slice %227 {offsets = [0, 1, 0], sizes = [2, 1, 96], strides = [1, 1, 1]} : vector<2x8x96xf32> to vector<2x1x96xf32>
    %255 = vector.shape_cast %254 : vector<2x1x96xf32> to vector<2x96xf32>
    %cst_68 = arith.constant dense<0.000000e+00> : vector<2x96xf32>
    %256 = tpu.matmul %251, %222, %cst_68 {dimension_numbers = #tpu.dot_dimension_numbers<[1], [0], [0], [1], [0, 0, 1, 1], [], []>} : vector<2x32xf32>, vector<32x96xf32>, vector<2x96xf32> -> vector<2x96xf32>
    %257 = vector.extract_strided_slice %255 {offsets = [0, 0], sizes = [2, 64], strides = [1, 1]} : vector<2x96xf32> to vector<2x64xf32>
    %258 = vector.extract_strided_slice %256 {offsets = [0, 0], sizes = [2, 64], strides = [1, 1]} : vector<2x96xf32> to vector<2x64xf32>
    %259 = arith.addf %257, %258 : vector<2x64xf32>
    %260 = arith.negf %259 : vector<2x64xf32>
    %261 = math.exp %260 : vector<2x64xf32>
    %cst_69 = arith.constant 1.000000e+00 : f32
    %262 = vector.broadcast %cst_69 : f32 to vector<2x64xf32>
    %263 = arith.addf %262, %261 : vector<2x64xf32>
    %264 = arith.divf %262, %263 : vector<2x64xf32>
    %265 = vector.extract_strided_slice %264 {offsets = [0, 0], sizes = [2, 32], strides = [1, 1]} : vector<2x64xf32> to vector<2x32xf32>
    %266 = vector.extract_strided_slice %264 {offsets = [0, 32], sizes = [2, 32], strides = [1, 1]} : vector<2x64xf32> to vector<2x32xf32>
    %267 = vector.extract_strided_slice %255 {offsets = [0, 64], sizes = [2, 32], strides = [1, 1]} : vector<2x96xf32> to vector<2x32xf32>
    %268 = vector.extract_strided_slice %256 {offsets = [0, 64], sizes = [2, 32], strides = [1, 1]} : vector<2x96xf32> to vector<2x32xf32>
    %269 = vector.broadcast %223 : vector<1x32xf32> to vector<2x32xf32>
    %270 = arith.addf %268, %269 : vector<2x32xf32>
    %271 = arith.mulf %265, %270 : vector<2x32xf32>
    %272 = arith.addf %267, %271 : vector<2x32xf32>
    %273 = math.tanh %272 : vector<2x32xf32>
    %274 = arith.subf %251, %273 : vector<2x32xf32>
    %275 = arith.mulf %266, %274 : vector<2x32xf32>
    %276 = arith.addf %273, %275 : vector<2x32xf32>
    %277 = vector.shape_cast %276 : vector<2x32xf32> to vector<2x1x32xf32>
    %c0_70 = arith.constant 0 : index
    %c1_71 = arith.constant 1 : index
    %c0_72 = arith.constant 0 : index
    %278 = vector.load %arg11[%c0_70, %c1_71, %c0_72] : memref<2x8x32xf32, #tpu.memory_space<vmem>>, vector<2x1x32xf32>
    tpu.vector_store %arg11[%c0_70, %c1_71, %c0_72], %277 {strides = array<i32>} : memref<2x8x32xf32, #tpu.memory_space<vmem>>, vector<2x1x32xf32>,
    %279 = vector.extract_strided_slice %227 {offsets = [0, 2, 0], sizes = [2, 1, 96], strides = [1, 1, 1]} : vector<2x8x96xf32> to vector<2x1x96xf32>
    %280 = vector.shape_cast %279 : vector<2x1x96xf32> to vector<2x96xf32>
    %cst_73 = arith.constant dense<0.000000e+00> : vector<2x96xf32>
    %281 = tpu.matmul %276, %222, %cst_73 {dimension_numbers = #tpu.dot_dimension_numbers<[1], [0], [0], [1], [0, 0, 1, 1], [], []>} : vector<2x32xf32>, vector<32x96xf32>, vector<2x96xf32> -> vector<2x96xf32>
    %282 = vector.extract_strided_slice %280 {offsets = [0, 0], sizes = [2, 64], strides = [1, 1]} : vector<2x96xf32> to vector<2x64xf32>
    %283 = vector.extract_strided_slice %281 {offsets = [0, 0], sizes = [2, 64], strides = [1, 1]} : vector<2x96xf32> to vector<2x64xf32>
    %284 = arith.addf %282, %283 : vector<2x64xf32>
    %285 = arith.negf %284 : vector<2x64xf32>
    %286 = math.exp %285 : vector<2x64xf32>
    %cst_74 = arith.constant 1.000000e+00 : f32
    %287 = vector.broadcast %cst_74 : f32 to vector<2x64xf32>
    %288 = arith.addf %287, %286 : vector<2x64xf32>
    %289 = arith.divf %287, %288 : vector<2x64xf32>
    %290 = vector.extract_strided_slice %289 {offsets = [0, 0], sizes = [2, 32], strides = [1, 1]} : vector<2x64xf32> to vector<2x32xf32>
    %291 = vector.extract_strided_slice %289 {offsets = [0, 32], sizes = [2, 32], strides = [1, 1]} : vector<2x64xf32> to vector<2x32xf32>
    %292 = vector.extract_strided_slice %280 {offsets = [0, 64], sizes = [2, 32], strides = [1, 1]} : vector<2x96xf32> to vector<2x32xf32>
    %293 = vector.extract_strided_slice %281 {offsets = [0, 64], sizes = [2, 32], strides = [1, 1]} : vector<2x96xf32> to vector<2x32xf32>
    %294 = vector.broadcast %223 : vector<1x32xf32> to vector<2x32xf32>
    %295 = arith.addf %293, %294 : vector<2x32xf32>
    %296 = arith.mulf %290, %295 : vector<2x32xf32>
    %297 = arith.addf %292, %296 : vector<2x32xf32>
    %298 = math.tanh %297 : vector<2x32xf32>
    %299 = arith.subf %276, %298 : vector<2x32xf32>
    %300 = arith.mulf %291, %299 : vector<2x32xf32>
    %301 = arith.addf %298, %300 : vector<2x32xf32>
    %302 = vector.shape_cast %301 : vector<2x32xf32> to vector<2x1x32xf32>
    %c0_75 = arith.constant 0 : index
    %c2_76 = arith.constant 2 : index
    %c0_77 = arith.constant 0 : index
    %303 = vector.load %arg11[%c0_75, %c2_76, %c0_77] : memref<2x8x32xf32, #tpu.memory_space<vmem>>, vector<2x1x32xf32>
    tpu.vector_store %arg11[%c0_75, %c2_76, %c0_77], %302 {strides = array<i32>} : memref<2x8x32xf32, #tpu.memory_space<vmem>>, vector<2x1x32xf32>,
    %304 = vector.extract_strided_slice %227 {offsets = [0, 3, 0], sizes = [2, 1, 96], strides = [1, 1, 1]} : vector<2x8x96xf32> to vector<2x1x96xf32>
    %305 = vector.shape_cast %304 : vector<2x1x96xf32> to vector<2x96xf32>
    %cst_78 = arith.constant dense<0.000000e+00> : vector<2x96xf32>
    %306 = tpu.matmul %301, %222, %cst_78 {dimension_numbers = #tpu.dot_dimension_numbers<[1], [0], [0], [1], [0, 0, 1, 1], [], []>} : vector<2x32xf32>, vector<32x96xf32>, vector<2x96xf32> -> vector<2x96xf32>
    %307 = vector.extract_strided_slice %305 {offsets = [0, 0], sizes = [2, 64], strides = [1, 1]} : vector<2x96xf32> to vector<2x64xf32>
    %308 = vector.extract_strided_slice %306 {offsets = [0, 0], sizes = [2, 64], strides = [1, 1]} : vector<2x96xf32> to vector<2x64xf32>
    %309 = arith.addf %307, %308 : vector<2x64xf32>
    %310 = arith.negf %309 : vector<2x64xf32>
    %311 = math.exp %310 : vector<2x64xf32>
    %cst_79 = arith.constant 1.000000e+00 : f32
    %312 = vector.broadcast %cst_79 : f32 to vector<2x64xf32>
    %313 = arith.addf %312, %311 : vector<2x64xf32>
    %314 = arith.divf %312, %313 : vector<2x64xf32>
    %315 = vector.extract_strided_slice %314 {offsets = [0, 0], sizes = [2, 32], strides = [1, 1]} : vector<2x64xf32> to vector<2x32xf32>
    %316 = vector.extract_strided_slice %314 {offsets = [0, 32], sizes = [2, 32], strides = [1, 1]} : vector<2x64xf32> to vector<2x32xf32>
    %317 = vector.extract_strided_slice %305 {offsets = [0, 64], sizes = [2, 32], strides = [1, 1]} : vector<2x96xf32> to vector<2x32xf32>
    %318 = vector.extract_strided_slice %306 {offsets = [0, 64], sizes = [2, 32], strides = [1, 1]} : vector<2x96xf32> to vector<2x32xf32>
    %319 = vector.broadcast %223 : vector<1x32xf32> to vector<2x32xf32>
    %320 = arith.addf %318, %319 : vector<2x32xf32>
    %321 = arith.mulf %315, %320 : vector<2x32xf32>
    %322 = arith.addf %317, %321 : vector<2x32xf32>
    %323 = math.tanh %322 : vector<2x32xf32>
    %324 = arith.subf %301, %323 : vector<2x32xf32>
    %325 = arith.mulf %316, %324 : vector<2x32xf32>
    %326 = arith.addf %323, %325 : vector<2x32xf32>
    %327 = vector.shape_cast %326 : vector<2x32xf32> to vector<2x1x32xf32>
    %c0_80 = arith.constant 0 : index
    %c3_81 = arith.constant 3 : index
    %c0_82 = arith.constant 0 : index
    %328 = vector.load %arg11[%c0_80, %c3_81, %c0_82] : memref<2x8x32xf32, #tpu.memory_space<vmem>>, vector<2x1x32xf32>
    tpu.vector_store %arg11[%c0_80, %c3_81, %c0_82], %327 {strides = array<i32>} : memref<2x8x32xf32, #tpu.memory_space<vmem>>, vector<2x1x32xf32>,
    %329 = vector.extract_strided_slice %227 {offsets = [0, 4, 0], sizes = [2, 1, 96], strides = [1, 1, 1]} : vector<2x8x96xf32> to vector<2x1x96xf32>
    %330 = vector.shape_cast %329 : vector<2x1x96xf32> to vector<2x96xf32>
    %cst_83 = arith.constant dense<0.000000e+00> : vector<2x96xf32>
    %331 = tpu.matmul %326, %222, %cst_83 {dimension_numbers = #tpu.dot_dimension_numbers<[1], [0], [0], [1], [0, 0, 1, 1], [], []>} : vector<2x32xf32>, vector<32x96xf32>, vector<2x96xf32> -> vector<2x96xf32>
    %332 = vector.extract_strided_slice %330 {offsets = [0, 0], sizes = [2, 64], strides = [1, 1]} : vector<2x96xf32> to vector<2x64xf32>
    %333 = vector.extract_strided_slice %331 {offsets = [0, 0], sizes = [2, 64], strides = [1, 1]} : vector<2x96xf32> to vector<2x64xf32>
    %334 = arith.addf %332, %333 : vector<2x64xf32>
    %335 = arith.negf %334 : vector<2x64xf32>
    %336 = math.exp %335 : vector<2x64xf32>
    %cst_84 = arith.constant 1.000000e+00 : f32
    %337 = vector.broadcast %cst_84 : f32 to vector<2x64xf32>
    %338 = arith.addf %337, %336 : vector<2x64xf32>
    %339 = arith.divf %337, %338 : vector<2x64xf32>
    %340 = vector.extract_strided_slice %339 {offsets = [0, 0], sizes = [2, 32], strides = [1, 1]} : vector<2x64xf32> to vector<2x32xf32>
    %341 = vector.extract_strided_slice %339 {offsets = [0, 32], sizes = [2, 32], strides = [1, 1]} : vector<2x64xf32> to vector<2x32xf32>
    %342 = vector.extract_strided_slice %330 {offsets = [0, 64], sizes = [2, 32], strides = [1, 1]} : vector<2x96xf32> to vector<2x32xf32>
    %343 = vector.extract_strided_slice %331 {offsets = [0, 64], sizes = [2, 32], strides = [1, 1]} : vector<2x96xf32> to vector<2x32xf32>
    %344 = vector.broadcast %223 : vector<1x32xf32> to vector<2x32xf32>
    %345 = arith.addf %343, %344 : vector<2x32xf32>
    %346 = arith.mulf %340, %345 : vector<2x32xf32>
    %347 = arith.addf %342, %346 : vector<2x32xf32>
    %348 = math.tanh %347 : vector<2x32xf32>
    %349 = arith.subf %326, %348 : vector<2x32xf32>
    %350 = arith.mulf %341, %349 : vector<2x32xf32>
    %351 = arith.addf %348, %350 : vector<2x32xf32>
    %352 = vector.shape_cast %351 : vector<2x32xf32> to vector<2x1x32xf32>
    %c0_85 = arith.constant 0 : index
    %c4_86 = arith.constant 4 : index
    %c0_87 = arith.constant 0 : index
    %353 = vector.load %arg11[%c0_85, %c4_86, %c0_87] : memref<2x8x32xf32, #tpu.memory_space<vmem>>, vector<2x1x32xf32>
    tpu.vector_store %arg11[%c0_85, %c4_86, %c0_87], %352 {strides = array<i32>} : memref<2x8x32xf32, #tpu.memory_space<vmem>>, vector<2x1x32xf32>,
    %354 = vector.extract_strided_slice %227 {offsets = [0, 5, 0], sizes = [2, 1, 96], strides = [1, 1, 1]} : vector<2x8x96xf32> to vector<2x1x96xf32>
    %355 = vector.shape_cast %354 : vector<2x1x96xf32> to vector<2x96xf32>
    %cst_88 = arith.constant dense<0.000000e+00> : vector<2x96xf32>
    %356 = tpu.matmul %351, %222, %cst_88 {dimension_numbers = #tpu.dot_dimension_numbers<[1], [0], [0], [1], [0, 0, 1, 1], [], []>} : vector<2x32xf32>, vector<32x96xf32>, vector<2x96xf32> -> vector<2x96xf32>
    %357 = vector.extract_strided_slice %355 {offsets = [0, 0], sizes = [2, 64], strides = [1, 1]} : vector<2x96xf32> to vector<2x64xf32>
    %358 = vector.extract_strided_slice %356 {offsets = [0, 0], sizes = [2, 64], strides = [1, 1]} : vector<2x96xf32> to vector<2x64xf32>
    %359 = arith.addf %357, %358 : vector<2x64xf32>
    %360 = arith.negf %359 : vector<2x64xf32>
    %361 = math.exp %360 : vector<2x64xf32>
    %cst_89 = arith.constant 1.000000e+00 : f32
    %362 = vector.broadcast %cst_89 : f32 to vector<2x64xf32>
    %363 = arith.addf %362, %361 : vector<2x64xf32>
    %364 = arith.divf %362, %363 : vector<2x64xf32>
    %365 = vector.extract_strided_slice %364 {offsets = [0, 0], sizes = [2, 32], strides = [1, 1]} : vector<2x64xf32> to vector<2x32xf32>
    %366 = vector.extract_strided_slice %364 {offsets = [0, 32], sizes = [2, 32], strides = [1, 1]} : vector<2x64xf32> to vector<2x32xf32>
    %367 = vector.extract_strided_slice %355 {offsets = [0, 64], sizes = [2, 32], strides = [1, 1]} : vector<2x96xf32> to vector<2x32xf32>
    %368 = vector.extract_strided_slice %356 {offsets = [0, 64], sizes = [2, 32], strides = [1, 1]} : vector<2x96xf32> to vector<2x32xf32>
    %369 = vector.broadcast %223 : vector<1x32xf32> to vector<2x32xf32>
    %370 = arith.addf %368, %369 : vector<2x32xf32>
    %371 = arith.mulf %365, %370 : vector<2x32xf32>
    %372 = arith.addf %367, %371 : vector<2x32xf32>
    %373 = math.tanh %372 : vector<2x32xf32>
    %374 = arith.subf %351, %373 : vector<2x32xf32>
    %375 = arith.mulf %366, %374 : vector<2x32xf32>
    %376 = arith.addf %373, %375 : vector<2x32xf32>
    %377 = vector.shape_cast %376 : vector<2x32xf32> to vector<2x1x32xf32>
    %c0_90 = arith.constant 0 : index
    %c5_91 = arith.constant 5 : index
    %c0_92 = arith.constant 0 : index
    %378 = vector.load %arg11[%c0_90, %c5_91, %c0_92] : memref<2x8x32xf32, #tpu.memory_space<vmem>>, vector<2x1x32xf32>
    tpu.vector_store %arg11[%c0_90, %c5_91, %c0_92], %377 {strides = array<i32>} : memref<2x8x32xf32, #tpu.memory_space<vmem>>, vector<2x1x32xf32>,
    %379 = vector.extract_strided_slice %227 {offsets = [0, 6, 0], sizes = [2, 1, 96], strides = [1, 1, 1]} : vector<2x8x96xf32> to vector<2x1x96xf32>
    %380 = vector.shape_cast %379 : vector<2x1x96xf32> to vector<2x96xf32>
    %cst_93 = arith.constant dense<0.000000e+00> : vector<2x96xf32>
    %381 = tpu.matmul %376, %222, %cst_93 {dimension_numbers = #tpu.dot_dimension_numbers<[1], [0], [0], [1], [0, 0, 1, 1], [], []>} : vector<2x32xf32>, vector<32x96xf32>, vector<2x96xf32> -> vector<2x96xf32>
    %382 = vector.extract_strided_slice %380 {offsets = [0, 0], sizes = [2, 64], strides = [1, 1]} : vector<2x96xf32> to vector<2x64xf32>
    %383 = vector.extract_strided_slice %381 {offsets = [0, 0], sizes = [2, 64], strides = [1, 1]} : vector<2x96xf32> to vector<2x64xf32>
    %384 = arith.addf %382, %383 : vector<2x64xf32>
    %385 = arith.negf %384 : vector<2x64xf32>
    %386 = math.exp %385 : vector<2x64xf32>
    %cst_94 = arith.constant 1.000000e+00 : f32
    %387 = vector.broadcast %cst_94 : f32 to vector<2x64xf32>
    %388 = arith.addf %387, %386 : vector<2x64xf32>
    %389 = arith.divf %387, %388 : vector<2x64xf32>
    %390 = vector.extract_strided_slice %389 {offsets = [0, 0], sizes = [2, 32], strides = [1, 1]} : vector<2x64xf32> to vector<2x32xf32>
    %391 = vector.extract_strided_slice %389 {offsets = [0, 32], sizes = [2, 32], strides = [1, 1]} : vector<2x64xf32> to vector<2x32xf32>
    %392 = vector.extract_strided_slice %380 {offsets = [0, 64], sizes = [2, 32], strides = [1, 1]} : vector<2x96xf32> to vector<2x32xf32>
    %393 = vector.extract_strided_slice %381 {offsets = [0, 64], sizes = [2, 32], strides = [1, 1]} : vector<2x96xf32> to vector<2x32xf32>
    %394 = vector.broadcast %223 : vector<1x32xf32> to vector<2x32xf32>
    %395 = arith.addf %393, %394 : vector<2x32xf32>
    %396 = arith.mulf %390, %395 : vector<2x32xf32>
    %397 = arith.addf %392, %396 : vector<2x32xf32>
    %398 = math.tanh %397 : vector<2x32xf32>
    %399 = arith.subf %376, %398 : vector<2x32xf32>
    %400 = arith.mulf %391, %399 : vector<2x32xf32>
    %401 = arith.addf %398, %400 : vector<2x32xf32>
    %402 = vector.shape_cast %401 : vector<2x32xf32> to vector<2x1x32xf32>
    %c0_95 = arith.constant 0 : index
    %c6_96 = arith.constant 6 : index
    %c0_97 = arith.constant 0 : index
    %403 = vector.load %arg11[%c0_95, %c6_96, %c0_97] : memref<2x8x32xf32, #tpu.memory_space<vmem>>, vector<2x1x32xf32>
    tpu.vector_store %arg11[%c0_95, %c6_96, %c0_97], %402 {strides = array<i32>} : memref<2x8x32xf32, #tpu.memory_space<vmem>>, vector<2x1x32xf32>,
    %404 = vector.extract_strided_slice %227 {offsets = [0, 7, 0], sizes = [2, 1, 96], strides = [1, 1, 1]} : vector<2x8x96xf32> to vector<2x1x96xf32>
    %405 = vector.shape_cast %404 : vector<2x1x96xf32> to vector<2x96xf32>
    %cst_98 = arith.constant dense<0.000000e+00> : vector<2x96xf32>
    %406 = tpu.matmul %401, %222, %cst_98 {dimension_numbers = #tpu.dot_dimension_numbers<[1], [0], [0], [1], [0, 0, 1, 1], [], []>} : vector<2x32xf32>, vector<32x96xf32>, vector<2x96xf32> -> vector<2x96xf32>
    %407 = vector.extract_strided_slice %405 {offsets = [0, 0], sizes = [2, 64], strides = [1, 1]} : vector<2x96xf32> to vector<2x64xf32>
    %408 = vector.extract_strided_slice %406 {offsets = [0, 0], sizes = [2, 64], strides = [1, 1]} : vector<2x96xf32> to vector<2x64xf32>
    %409 = arith.addf %407, %408 : vector<2x64xf32>
    %410 = arith.negf %409 : vector<2x64xf32>
    %411 = math.exp %410 : vector<2x64xf32>
    %cst_99 = arith.constant 1.000000e+00 : f32
    %412 = vector.broadcast %cst_99 : f32 to vector<2x64xf32>
    %413 = arith.addf %412, %411 : vector<2x64xf32>
    %414 = arith.divf %412, %413 : vector<2x64xf32>
    %415 = vector.extract_strided_slice %414 {offsets = [0, 0], sizes = [2, 32], strides = [1, 1]} : vector<2x64xf32> to vector<2x32xf32>
    %416 = vector.extract_strided_slice %414 {offsets = [0, 32], sizes = [2, 32], strides = [1, 1]} : vector<2x64xf32> to vector<2x32xf32>
    %417 = vector.extract_strided_slice %405 {offsets = [0, 64], sizes = [2, 32], strides = [1, 1]} : vector<2x96xf32> to vector<2x32xf32>
    %418 = vector.extract_strided_slice %406 {offsets = [0, 64], sizes = [2, 32], strides = [1, 1]} : vector<2x96xf32> to vector<2x32xf32>
    %419 = vector.broadcast %223 : vector<1x32xf32> to vector<2x32xf32>
    %420 = arith.addf %418, %419 : vector<2x32xf32>
    %421 = arith.mulf %415, %420 : vector<2x32xf32>
    %422 = arith.addf %417, %421 : vector<2x32xf32>
    %423 = math.tanh %422 : vector<2x32xf32>
    %424 = arith.subf %401, %423 : vector<2x32xf32>
    %425 = arith.mulf %416, %424 : vector<2x32xf32>
    %426 = arith.addf %423, %425 : vector<2x32xf32>
    %427 = vector.shape_cast %426 : vector<2x32xf32> to vector<2x1x32xf32>
    %c0_100 = arith.constant 0 : index
    %c7_101 = arith.constant 7 : index
    %c0_102 = arith.constant 0 : index
    %428 = vector.load %arg11[%c0_100, %c7_101, %c0_102] : memref<2x8x32xf32, #tpu.memory_space<vmem>>, vector<2x1x32xf32>
    tpu.vector_store %arg11[%c0_100, %c7_101, %c0_102], %427 {strides = array<i32>} : memref<2x8x32xf32, #tpu.memory_space<vmem>>, vector<2x1x32xf32>,
    return
  }
}

</mosaic_0001>

<bundles_post_ra>
// kernel: gru_model_forward.1
= control target key start
LH: loop header
LB: loop body
LE: loop exit
PB: predicated region body
PF: predicated region fallthrough
CT: control target
= control target key end

     0   :  { %16 = vsyncpa [#allocation4], 0  ;;  %s4449_s0 = inlined_call_operand.vmem [shape: f32[2,8,4], index: 0, kind: input, shape index: {}]   ;;  %s4450_s1 = inlined_call_operand.vmem [shape: f32[4,16], index: 1, kind: input, shape index: {}]   ;;  %s4451_s2 = inlined_call_operand.vmem [shape: f32[1,16], index: 2, kind: input, shape index: {}]   ;;  %s4452_s3 = inlined_call_operand.hbm [shape: f32[16,96], index: 3, kind: input, shape index: {}]   ;;  %s4453_s4 = inlined_call_operand.vmem [shape: f32[1,96], index: 4, kind: input, shape index: {}]   ;;  %s4454_s5 = inlined_call_operand.vmem [shape: f32[32,96], index: 5, kind: input, shape index: {}]   ;;  %s4455_s6 = inlined_call_operand.vmem [shape: f32[1,32], index: 6, kind: input, shape index: {}]   ;;  %s4456_s7 = inlined_call_operand.hbm [shape: f32[32,96], index: 7, kind: input, shape index: {}]   ;;  %s4457_s8 = inlined_call_operand.vmem [shape: f32[1,96], index: 8, kind: input, shape index: {}]   ;;  %s4458_s9 = inlined_call_operand.hbm [shape: f32[32,96], index: 9, kind: input, shape index: {}]   ;;  %s4459_s10 = inlined_call_operand.vmem [shape: f32[1,32], index: 10, kind: input, shape index: {}]   ;;  %s4460_s11 = inlined_call_operand.hbm [shape: f32[2,8,32], index: 11, kind: output, shape index: {}]  }
   0x1   :  { %17 = vsyncpa [#allocation7], 0 }
   0x2   :  { %18 = vsyncpa [#allocation5], 0  ;;  %s3694_s17 = smov [#allocation6]   ;;  %s3695_s19 = smov [#allocation3]  }
   0x3   :  { %s48_s18 = sshll.u32 %s3694_s17, 4  ;;  %s30_s20 = sshll.u32 %s3695_s19, 4  ;;  %s49_s18 = int_to_ptr.vmem [resolvable:$true] %s48_s18  ;;  %s3766_s20 = int_to_ptr.vmem [resolvable:$true] %s30_s20 }
   0x4   :  { %s3600_s23 = scalar_lea.hbm %s4456_s7, 512 }
   0x5   :  { %p3601_p0 = scmp.ne.s32.totalorder %s4456_s7, %s3600_s23  ;;  %p3604_p1 = scmp.lt.u32.totalorder %s3600_s23, %s4456_s7 }
   0x7   :  { %p3606_p2 = pnand %p3604_p1, %p3601_p0 }
   0x9   :  { %3609 = shalt.err (!%p3606_p2)
}
   0xa   :  { %s3610_s28 = scalar_lea.vmem %s49_s18, 512  ;;  %p3615_p4 = scmp.lt.s32.totalorder %s49_s18, %s49_s18 }
   0xb   :  { %p3611_p3 = scmp.ne.s32.totalorder %s49_s18, %s3610_s28  ;;  %p3616_p5 = scmp.lt.s32.totalorder %s3610_s28, %s3610_s28 }
   0xd   :  { %p3617_p6 = por %p3616_p5, %p3615_p4 }
   0xf   :  { %p3618_p7 = pnand %p3617_p6, %p3611_p3 }
  0x11   :  { %3621 = shalt.err (!%p3618_p7)
}
  0x12   :  { %s3696_s29 = smov 128   ;;  %s3697_s30 = smov 8  }
  0x13   :  { %54 = dma.hbm_to_vmem [thread:$0]  %s4456_s7, 512, %s49_s18, [#allocation7], %s3696_s29, %s3696_s29, %s3697_s30  }
  0x14   :  { %s3622_s16 = scalar_lea.hbm %s4452_s3, 256 }
  0x15   :  { %p3623_p8 = scmp.ne.s32.totalorder %s4452_s3, %s3622_s16  ;;  %p3626_p9 = scmp.lt.u32.totalorder %s3622_s16, %s4452_s3 }
  0x17   :  { %p3628_p10 = pnand %p3626_p9, %p3623_p8 }
  0x19   :  { %3631 = shalt.err (!%p3628_p10)
}
  0x1a   :  { %s3632_s23 = scalar_lea.vmem %s3766_s20, 256  ;;  %p3637_p12 = scmp.lt.s32.totalorder %s3766_s20, %s3766_s20 }
  0x1b   :  { %p3633_p11 = scmp.ne.s32.totalorder %s3766_s20, %s3632_s23  ;;  %p3638_p13 = scmp.lt.s32.totalorder %s3632_s23, %s3632_s23 }
  0x1d   :  { %p3639_p0 = por %p3638_p13, %p3637_p12 }
  0x1f   :  { %p3640_p1 = pnand %p3639_p0, %p3633_p11 }
  0x21   :  { %3643 = shalt.err (!%p3640_p1)
}
  0x22   :  { %36 = dma.hbm_to_vmem [thread:$0]  %s4452_s3, 256, %s3766_s20, [#allocation4], %s3696_s29, %s3696_s29, %s3697_s30  }
  0x23   :  { %s3698_s24 = smov [#allocation8]   ;;  %s3644_s28 = scalar_lea.hbm %s4458_s9, 512 }
  0x24   :  { %s62_s25 = sshll.u32 %s3698_s24, 4  ;;  %p3645_p2 = scmp.ne.s32.totalorder %s4458_s9, %s3644_s28  ;;  %s63_s25 = int_to_ptr.vmem [resolvable:$true] %s62_s25 }
  0x25   :  { %p3648_p3 = scmp.lt.u32.totalorder %s3644_s28, %s4458_s9 }
  0x27   :  { %p3650_p4 = pnand %p3648_p3, %p3645_p2 }
  0x29   :  { %3653 = shalt.err (!%p3650_p4)
}
  0x2a   :  { %s3654_s16 = scalar_lea.vmem %s63_s25, 512  ;;  %p3659_p6 = scmp.lt.s32.totalorder %s63_s25, %s63_s25 }
  0x2b   :  { %p3655_p5 = scmp.ne.s32.totalorder %s63_s25, %s3654_s16  ;;  %p3660_p7 = scmp.lt.s32.totalorder %s3654_s16, %s3654_s16 }
  0x2d   :  { %p3661_p8 = por %p3660_p7, %p3659_p6 }
  0x2f   :  { %p3662_p9 = pnand %p3661_p8, %p3655_p5 }
  0x31   :  { %3665 = shalt.err (!%p3662_p9)
}
  0x32   :  { %68 = dma.hbm_to_vmem [thread:$0]  %s4458_s9, 512, %s63_s25, [#allocation7], %s3696_s29, %s3696_s29, %s3697_s30  }
  0x33   :  { %3688 = dma.done.wait [#allocation4], 256  }
  0x34   :  { %3689 = vsyncadd [#allocation4], 4294967040 }
  0x35   :  { %3690 = dma.done.wait [#allocation7], 1024  }
  0x36   :  { %3691 = vsyncadd [#allocation7], 4294966272  ;;  %v3699_v0 = vmov 0.0|0.0   ;;  %vm3700_vm0 = vmmov 0   ;;  %v3701_v1 = vmov 0.0   ;;  %vm97_vm1 = vcmask 1043456  }
  0x37   :  { %3292 = vmatprep.subr.bf16.mxu0 %v3699_v0  ;;  %3109 = vmatprep.mubr.msk.f32.mxu0 %vm3700_vm0, %v3701_v1  ;;  %vm90_vm2 = vcmask 31744   ;;  %v82_v2 = vld [vmem:[%s4450_s1] sm:$0xf]  ;;  %v81_v4 = vld [vmem:[%s4449_s0 + $0x8] sm:$0xff]  ;;  %v183_v7 = vld [vmem:[%s4454_s5 + $0x10] sm:$0xff]  ;;  %s3702_s12 = smov 64  }
  0x38   :  { %v80_v3 = vld [vmem:[%s4449_s0] sm:$0xff]  ;;  %3089 = vmatprep.subr.msk.mxu1 %vm97_vm1, %v82_v2  ;;  %v182_v6 = vld [vmem:[%s4454_s5 + $0x8] sm:$0xff]  ;;  %v184_v9 = vld [vmem:[%s4454_s5 + $0x18] sm:$0xff]  ;;  %vm192_vm3 = vcmask 130048   ;;  %s3704_s15 = smov 32   ;;  %vm431_vm4 = vcmask 1041409  }
  0x39   :  { %3091 = vmatprep.mubr.msk.f32.mxu1 %vm90_vm2, %v80_v3  ;;  %v181_v5 = vld [vmem:[%s4454_s5] sm:$0xff]  ;;  %3090 = vmatpush3.msk.msra.mxu1 %vm97_vm1, %v82_v2  ;;  %v3845_v10 = vpack.c.bf16 %v184_v9, %v183_v7  ;;  %v179_v12 = vld [vmem:[#allocation3 + $0x8] sm:$0xff]  ;;  %vm274_vm5 = vcmask 261120   ;;  %vm586_vm6 = vcmask 254977   ;;  %vm427_vm7 = vcmask 253952  }
  0x3a   :  { %v3839_v8 = vpack.c.bf16 %v182_v6, %v181_v5  ;;  %3092 = vmatmul.mubr.msk.f32.vlgmr.msra.gmra.mrb[0].mxu1 %vm90_vm2, %v81_v4  ;;  %v178_v11 = vld [vmem:[#allocation3] sm:$0xff]  ;;  %vm907_vm8 = vcmask 257027   ;;  %vm746_vm9 = vcmask 256002   ;;  %vm1229_vm10 = vcmask 259077  }
  0x3b   :  { %v3288_v13 = vpack.c.bf16 %v179_v12, %v178_v11  ;;  %v2947_v14 = vld [vmem:[%s4455_s6] ss:$0 sm:$0xff]  ;;  %vm1068_vm11 = vcmask 258052   ;;  %vm1390_vm12 = vcmask 260102   ;;  %vm1551_vm13 = vcmask 261127  }
  0x3c   :  { %3294 = vmatpush3.bf16.msra.mxu0 %v3839_v8  ;;  %371 = vrot.lane.b32.xlu0 %v2947_v14, %s3702_s12  ;;  %v2938_v15 = vld [vmem:[%s4451_s2] ss:$0 sm:$0xff] }
  0x3d   :  { %3295 = vmatprep.subr.bf16.mxu0 %v3699_v0  ;;  %3289 = vmatprep.subr.bf16.mxu1 %v3288_v13  ;;  %v2942_v27 = vld [vmem:[%s4453_s4] ss:$0 sm:$0xff]  ;;  %s3703_s4 = smov 96  }
  0x3e   :  { %3291 = vmatpush3.bf16.msra.mxu1 %v3288_v13 }
  0x3f   :  { %3298 = vmatprep.subr.bf16.mxu1 %v3699_v0 }
  0x40   :  { %3297 = vmatpush3.bf16.msra.mxu0 %v3845_v10 }
  0x41   :  { %3304 = vmatprep.subr.bf16.mxu0 %v3699_v0 }
  0x43   :  { %3110 = vmatmul.mubr.f32.vlgmr.msra.gmra.mrb[0].mxu0 %v3701_v1 }
  0x44   :  { %3306 = vmatpush3.bf16.msra.mxu0 %v3839_v8  ;;  %3131 = vmatprep.mubr.msk.f32.mxu0 %vm3700_vm0, %v3701_v1 }
  0x45   :  { %3307 = vmatprep.subr.bf16.mxu0 %v3699_v0 }
  0x48   :  { %3309 = vmatpush3.bf16.msra.mxu0 %v3845_v10 }
  0x49   :  { %3316 = vmatprep.subr.bf16.mxu0 %v3699_v0 }
  0xae   :  { %v3865_v22 = vpop.permute.xlu0 %371 }
 0x10d   :  { %v3093_v16 = vpop.f32.mrb[0].mxu1 }
 0x10e   :  { %v173_v17 = vadd.f32 %v3093_v16, %v2938_v15  ;;  %v167_v18 = vpop.f32.mrb[1].mxu1 }
 0x10f   :  { %v168_v19 = vadd.f32 %v2938_v15, %v167_v18 }
 0x110   :  { %v177_v21 = vmax.f32 %v173_v17, 0.0 }
 0x111   :  { %v176_v20 = vmax.f32 %v168_v19, 0.0 }
 0x113   :  { %3098 = vmatprep.mubr.msk.f32.mxu1 %vm192_vm3, %v176_v20 }
 0x114   :  { %3099 = vmatmul.mubr.msk.f32.vlgmr.msra.gmra.mrb[2].mxu1 %vm192_vm3, %v177_v21 }
 0x115   :  { %3300 = vmatpush3.bf16.msra.mxu1 %v3839_v8  ;;  %3120 = vmatprep.mubr.msk.f32.mxu1 %vm3700_vm0, %v3701_v1 }
 0x116   :  { %v344_v23 = vpop.f32.mrb[0].mxu0  ;;  %3301 = vmatprep.subr.bf16.mxu1 %v3699_v0 }
 0x117   :  { %v3111_v24 = vpop.f32.mrb[1].mxu0  ;;  %v374_v25 = vadd.f32 %v3865_v22, %v344_v23  ;;  %v349_v29 = vrot.slane %v344_v23, 1 }
 0x119   :  { %377 = vrot.lane.b32.xlu1 %v374_v25, %s3702_s12  ;;  %v376_v26 = vrot.slane %v374_v25, 1  ;;  %3303 = vmatpush3.bf16.msra.mxu1 %v3845_v10 }
 0x11a   :  { %3310 = vmatprep.subr.bf16.mxu1 %v3699_v0 }
 0x11b   :  { %379 = vrot.lane.b32.xlu0 %v376_v26, %s3702_s12 }
 0x18b   :  { %v378_v44 = vpop.permute.xlu1 %377 }
 0x18d   :  { %v380_v41 = vpop.permute.xlu0 %379 }
 0x1e7   :  { %v3100_v28 = vpop.f32.mrb[2].mxu1 }
 0x1e8   :  { %v3879_v30 = vadd.f32 %v3100_v28, %v2942_v27  ;;  %v265_v31 = vpop.f32.mrb[3].mxu1 }
 0x1e9   :  { %v3881_v32 = vadd.f32 %v2942_v27, %v265_v31 }
 0x1ea   :  { %v353_v33 = vadd.f32 %v349_v29, %v3879_v30 }
 0x1eb   :  { %v352_v34 = vadd.f32 %v344_v23, %v3881_v32 }
 0x1ec   :  { %v2946_v35 = vmul.f32 -1.442695, %v353_v33 }
 0x1ed   :  { %v2945_v36 = vmul.f32 -1.442695, %v352_v34 }
 0x1ee   :  { %3408 = vpow2.f32 %v2946_v35 }
 0x1ef   :  { %3410 = vpow2.f32 %v2945_v36 }
 0x1f8   :  { %v3409_v37 = vpop.eup %3408 }
 0x1f9   :  { %v3411_v38 = vpop.eup %3410  ;;  %v361_v39 = vadd.f32 1.0, %v3409_v37 }
 0x1fa   :  { %v360_v40 = vadd.f32 1.0, %v3411_v38 }
 0x1fb   :  { %3412 = vrcp.f32 %v361_v39 }
 0x1fc   :  { %3414 = vrcp.f32 %v360_v40 }
 0x205   :  { %v3413_v42 = vpop.eup %3412 }
 0x206   :  { %v3415_v43 = vpop.eup %3414  ;;  %v384_v45 = vmul.f32 %v3413_v42, %v380_v41 }
 0x207   :  { %v383_v46 = vmul.f32 %v3415_v43, %v378_v44 }
 0x208   :  { %389 = vrot.lane.b32.xlu1 %v384_v45, %s3702_s12 }
 0x209   :  { %387 = vrot.lane.b32.xlu0 %v383_v46, %s3702_s12 }
 0x27a   :  { %v390_v47 = vpop.permute.xlu1 %389 }
 0x27b   :  { %v394_v48 = vadd.f32 %v390_v47, %v3879_v30  ;;  %v388_v49 = vpop.permute.xlu0 %387 }
 0x27c   :  { %v393_v50 = vadd.f32 %v388_v49, %v3881_v32 }
 0x27d   :  { %3416 = vtanh.f32 %v394_v48 }
 0x27e   :  { %3418 = vtanh.f32 %v393_v50 }
 0x287   :  { %v3417_v51 = vpop.eup %3416 }
 0x288   :  { %v3419_v52 = vpop.eup %3418  ;;  %v398_v53 = vsub.f32 0.0, %v3417_v51 }
 0x289   :  { %v397_v54 = vsub.f32 0.0, %v3419_v52 }
 0x28a   :  { %403 = vrot.lane.b32.xlu1 %v398_v53, %s3703_s4 }
 0x28b   :  { %401 = vrot.lane.b32.xlu0 %v397_v54, %s3703_s4 }
 0x2fc   :  { %v404_v55 = vpop.permute.xlu1 %403 }
 0x2fd   :  { %v408_v56 = vmul.f32 %v3413_v42, %v404_v55  ;;  %v402_v57 = vpop.permute.xlu0 %401 }
 0x2fe   :  { %v407_v58 = vmul.f32 %v3415_v43, %v402_v57 }
 0x2ff   :  { %413 = vrot.lane.b32.xlu1 %v408_v56, %s3704_s15 }
 0x300   :  { %411 = vrot.lane.b32.xlu0 %v407_v58, %s3704_s15 }
 0x371   :  { %v414_v59 = vpop.permute.xlu1 %413 }
 0x372   :  { %v3893_v60 = vadd.f32 %v3417_v51, %v414_v59  ;;  %v412_v61 = vpop.permute.xlu0 %411 }
 0x373   :  { %v3895_v62 = vadd.f32 %v3419_v52, %v412_v61 }
 0x374   :  { %v430_v63 = vrot.slane %v3893_v60, 7 }
 0x376   :  { %v432_v2 = vsel %vm431_vm4, %v430_v63, %v3895_v62 }
 0x377   :  { %433 = vrot.lane.b32.xlu1 %v432_v2, %s3702_s12 }
 0x3e9   :  { %v434_v3 = vpop.permute.xlu1 %433 }
 0x3ea   :  { %3121 = vmatmul.mubr.msk.f32.vlgmr.msra.gmra.mrb[4].mxu1 %vm274_vm5, %v434_v3 }
 0x3eb   :  { %3312 = vmatpush3.bf16.msra.mxu1 %v3839_v8  ;;  %3142 = vmatprep.mubr.msk.f32.mxu1 %vm3700_vm0, %v3701_v1 }
 0x3ec   :  { %3313 = vmatprep.subr.bf16.mxu1 %v3699_v0 }
 0x3ef   :  { %3315 = vmatpush3.bf16.msra.mxu1 %v3845_v10 }
 0x3f0   :  { %3322 = vmatprep.subr.bf16.mxu1 %v3699_v0 }
 0x4bd   :  { %v503_v4 = vpop.f32.mrb[4].mxu1 }
 0x4be   :  { %v525_v5 = vadd.f32 %v503_v4, %v3865_v22  ;;  %v3122_v6 = vpop.f32.mrb[5].mxu1  ;;  %v508_v9 = vrot.slane %v503_v4, 7  ;;  %v512_v11 = vadd.f32 %v503_v4, %v3879_v30 }
 0x4c0   :  { %530 = vrot.lane.b32.xlu1 %v525_v5, %s3702_s12  ;;  %v527_v7 = vrot.slane %v525_v5, 7  ;;  %v511_v12 = vadd.f32 %v508_v9, %v3881_v32  ;;  %v2950_v13 = vmul.f32 -1.442695, %v512_v11 }
 0x4c2   :  { %528 = vrot.lane.b32.xlu0 %v527_v7, %s3702_s12  ;;  %v2949_v14 = vmul.f32 -1.442695, %v511_v12  ;;  %3420 = vpow2.f32 %v2950_v13 }
 0x4c4   :  { %3422 = vpow2.f32 %v2949_v14 }
 0x4cc   :  { %v3421_v15 = vpop.eup %3420 }
 0x4cd   :  { %v520_v17 = vadd.f32 1.0, %v3421_v15 }
 0x4ce   :  { %v3423_v16 = vpop.eup %3422 }
 0x4cf   :  { %v519_v18 = vadd.f32 1.0, %v3423_v16  ;;  %3424 = vrcp.f32 %v520_v17 }
 0x4d1   :  { %3426 = vrcp.f32 %v519_v18 }
 0x4d9   :  { %v3425_v19 = vpop.eup %3424 }
 0x4db   :  { %v3427_v23 = vpop.eup %3426 }
 0x532   :  { %v531_v20 = vpop.permute.xlu1 %530 }
 0x533   :  { %v535_v21 = vmul.f32 %v3425_v19, %v531_v20 }
 0x534   :  { %v529_v24 = vpop.permute.xlu0 %528 }
 0x535   :  { %v534_v25 = vmul.f32 %v3427_v23, %v529_v24  ;;  %540 = vrot.lane.b32.xlu1 %v535_v21, %s3702_s12 }
 0x537   :  { %538 = vrot.lane.b32.xlu0 %v534_v25, %s3702_s12 }
 0x5a7   :  { %v541_v26 = vpop.permute.xlu1 %540 }
 0x5a8   :  { %v545_v27 = vadd.f32 %v541_v26, %v3879_v30 }
 0x5a9   :  { %v539_v28 = vpop.permute.xlu0 %538 }
 0x5aa   :  { %3428 = vtanh.f32 %v545_v27  ;;  %v544_v29 = vadd.f32 %v539_v28, %v3881_v32 }
 0x5ac   :  { %3430 = vtanh.f32 %v544_v29 }
 0x5b4   :  { %v3429_v31 = vpop.eup %3428 }
 0x5b5   :  { %v551_v33 = vrot.slane %v3429_v31, 1 }
 0x5b6   :  { %v3431_v34 = vpop.eup %3430 }
 0x5b7   :  { %v555_v35 = vsub.f32 %v3893_v60, %v551_v33  ;;  %v550_v36 = vrot.slane %v3431_v34, 1 }
 0x5b9   :  { %v559_v37 = vrot.slane %v555_v35, 7  ;;  %v554_v38 = vsub.f32 %v3895_v62, %v550_v36 }
 0x5bb   :  { %562 = vrot.lane.b32.xlu1 %v559_v37, %s3703_s4  ;;  %v558_v39 = vrot.slane %v554_v38, 7 }
 0x5bd   :  { %560 = vrot.lane.b32.xlu0 %v558_v39, %s3703_s4 }
 0x62d   :  { %v563_v40 = vpop.permute.xlu1 %562 }
 0x62e   :  { %v567_v41 = vmul.f32 %v3425_v19, %v563_v40 }
 0x62f   :  { %v561_v42 = vpop.permute.xlu0 %560 }
 0x630   :  { %v566_v43 = vmul.f32 %v3427_v23, %v561_v42  ;;  %572 = vrot.lane.b32.xlu1 %v567_v41, %s3704_s15 }
 0x632   :  { %570 = vrot.lane.b32.xlu0 %v566_v43, %s3704_s15 }
 0x6a2   :  { %v573_v44 = vpop.permute.xlu1 %572 }
 0x6a3   :  { %v3925_v47 = vadd.f32 %v3429_v31, %v573_v44 }
 0x6a4   :  { %v571_v45 = vpop.permute.xlu0 %570 }
 0x6a5   :  { %v3923_v46 = vadd.f32 %v3431_v34, %v571_v45 }
 0x6a7   :  { %v589_v48 = vrot.slane %v3923_v46, 1 }
 0x6a9   :  { %v590_v49 = vsel %vm431_vm4, %v3925_v47, %v589_v48 }
 0x6aa   :  { %591 = vrot.lane.b32.xlu0 %v590_v49, %s3702_s12 }
 0x71c   :  { %v592_v50 = vpop.permute.xlu0 %591 }
 0x71d   :  { %3132 = vmatmul.mubr.msk.f32.vlgmr.msra.gmra.mrb[2].mxu0 %vm274_vm5, %v592_v50 }
 0x71e   :  { %3318 = vmatpush3.bf16.msra.mxu0 %v3839_v8  ;;  %3153 = vmatprep.mubr.msk.f32.mxu0 %vm3700_vm0, %v3701_v1 }
 0x71f   :  { %3319 = vmatprep.subr.bf16.mxu0 %v3699_v0 }
 0x722   :  { %3321 = vmatpush3.bf16.msra.mxu0 %v3845_v10 }
 0x723   :  { %3328 = vmatprep.subr.bf16.mxu0 %v3699_v0 }
 0x7f0   :  { %v661_v51 = vpop.f32.mrb[2].mxu0 }
 0x7f1   :  { %v684_v52 = vadd.f32 %v661_v51, %v3865_v22  ;;  %v3133_v53 = vpop.f32.mrb[3].mxu0  ;;  %v666_v56 = vrot.slane %v661_v51, 6  ;;  %v667_v57 = vrot.slane %v661_v51, 7 }
 0x7f3   :  { %v687_v54 = vrot.slane %v684_v52, 7  ;;  %v686_v55 = vrot.slane %v684_v52, 6  ;;  %v670_v58 = vadd.f32 %v666_v56, %v3881_v32  ;;  %v671_v59 = vadd.f32 %v667_v57, %v3879_v30 }
 0x7f5   :  { %690 = vrot.lane.b32.xlu0 %v687_v54, %s3702_s12  ;;  %688 = vrot.lane.b32.xlu1 %v686_v55, %s3702_s12  ;;  %v2952_v61 = vmul.f32 -1.442695, %v670_v58  ;;  %v2953_v63 = vmul.f32 -1.442695, %v671_v59 }
 0x7f7   :  { %3432 = vpow2.f32 %v2952_v61 }
 0x7f8   :  { %3434 = vpow2.f32 %v2953_v63 }
 0x801   :  { %v3433_v2 = vpop.eup %3432 }
 0x802   :  { %v3435_v3 = vpop.eup %3434  ;;  %v678_v4 = vadd.f32 1.0, %v3433_v2 }
 0x803   :  { %v679_v5 = vadd.f32 1.0, %v3435_v3 }
 0x804   :  { %3436 = vrcp.f32 %v678_v4 }
 0x805   :  { %3438 = vrcp.f32 %v679_v5 }
 0x80e   :  { %v3437_v6 = vpop.eup %3436 }
 0x80f   :  { %v3439_v7 = vpop.eup %3438 }
 0x867   :  { %v691_v9 = vpop.permute.xlu0 %690  ;;  %v689_v11 = vpop.permute.xlu1 %688 }
 0x868   :  { %v695_v12 = vmul.f32 %v3439_v7, %v691_v9  ;;  %v694_v13 = vmul.f32 %v3437_v6, %v689_v11 }
 0x86a   :  { %700 = vrot.lane.b32.xlu0 %v695_v12, %s3702_s12  ;;  %698 = vrot.lane.b32.xlu1 %v694_v13, %s3702_s12 }
 0x8dc   :  { %v701_v14 = vpop.permute.xlu0 %700  ;;  %v699_v15 = vpop.permute.xlu1 %698 }
 0x8dd   :  { %v705_v16 = vadd.f32 %v701_v14, %v3879_v30  ;;  %v704_v17 = vadd.f32 %v699_v15, %v3881_v32 }
 0x8df   :  { %3440 = vtanh.f32 %v705_v16 }
 0x8e0   :  { %3442 = vtanh.f32 %v704_v17 }
 0x8e9   :  { %v3441_v18 = vpop.eup %3440 }
 0x8ea   :  { %v3443_v19 = vpop.eup %3442  ;;  %v711_v20 = vrot.slane %v3441_v18, 1 }
 0x8eb   :  { %v710_v21 = vrot.slane %v3443_v19, 1 }
 0x8ec   :  { %v715_v23 = vsub.f32 %v3925_v47, %v711_v20 }
 0x8ed   :  { %v714_v24 = vsub.f32 %v3923_v46, %v710_v21 }
 0x8ee   :  { %v719_v25 = vrot.slane %v715_v23, 7 }
 0x8ef   :  { %v718_v26 = vrot.slane %v714_v24, 7 }
 0x8f0   :  { %722 = vrot.lane.b32.xlu0 %v719_v25, %s3703_s4 }
 0x8f1   :  { %720 = vrot.lane.b32.xlu1 %v718_v26, %s3703_s4 }
 0x962   :  { %v723_v27 = vpop.permute.xlu0 %722 }
 0x963   :  { %v727_v28 = vmul.f32 %v3439_v7, %v723_v27  ;;  %v721_v29 = vpop.permute.xlu1 %720 }
 0x964   :  { %v726_v31 = vmul.f32 %v3437_v6, %v721_v29 }
 0x965   :  { %732 = vrot.lane.b32.xlu0 %v727_v28, %s3704_s15 }
 0x966   :  { %730 = vrot.lane.b32.xlu1 %v726_v31, %s3704_s15 }
 0x9d7   :  { %v733_v33 = vpop.permute.xlu0 %732 }
 0x9d8   :  { %v3953_v34 = vadd.f32 %v3441_v18, %v733_v33  ;;  %v731_v35 = vpop.permute.xlu1 %730 }
 0x9d9   :  { %v3955_v36 = vadd.f32 %v3443_v19, %v731_v35 }
 0x9da   :  { %v750_v37 = vrot.slane %v3953_v34, 1 }
 0x9db   :  { %v749_v38 = vrot.slane %v3955_v36, 2 }
 0x9dd   :  { %v751_v39 = vsel %vm431_vm4, %v750_v37, %v749_v38 }
 0x9de   :  { %752 = vrot.lane.b32.xlu1 %v751_v39, %s3702_s12 }
 0xa50   :  { %v753_v40 = vpop.permute.xlu1 %752 }
 0xa51   :  { %3143 = vmatmul.mubr.msk.f32.vlgmr.msra.gmra.mrb[6].mxu1 %vm274_vm5, %v753_v40 }
 0xa52   :  { %3324 = vmatpush3.bf16.msra.mxu1 %v3839_v8  ;;  %3164 = vmatprep.mubr.msk.f32.mxu1 %vm3700_vm0, %v3701_v1 }
 0xa53   :  { %3325 = vmatprep.subr.bf16.mxu1 %v3699_v0 }
 0xa56   :  { %3327 = vmatpush3.bf16.msra.mxu1 %v3845_v10 }
 0xa57   :  { %3334 = vmatprep.subr.bf16.mxu1 %v3699_v0 }
 0xb24   :  { %v822_v41 = vpop.f32.mrb[6].mxu1 }
 0xb25   :  { %v845_v42 = vadd.f32 %v822_v41, %v3865_v22  ;;  %v3144_v43 = vpop.f32.mrb[7].mxu1  ;;  %v827_v48 = vrot.slane %v822_v41, 5  ;;  %v828_v49 = vrot.slane %v822_v41, 6 }
 0xb27   :  { %v848_v44 = vrot.slane %v845_v42, 6  ;;  %v847_v45 = vrot.slane %v845_v42, 5  ;;  %v831_v50 = vadd.f32 %v827_v48, %v3881_v32  ;;  %v832_v51 = vadd.f32 %v828_v49, %v3879_v30 }
 0xb29   :  { %851 = vrot.lane.b32.xlu1 %v848_v44, %s3702_s12  ;;  %849 = vrot.lane.b32.xlu0 %v847_v45, %s3702_s12  ;;  %v2955_v52 = vmul.f32 -1.442695, %v831_v50  ;;  %v2956_v53 = vmul.f32 -1.442695, %v832_v51 }
 0xb2b   :  { %3444 = vpow2.f32 %v2955_v52 }
 0xb2c   :  { %3446 = vpow2.f32 %v2956_v53 }
 0xb35   :  { %v3445_v54 = vpop.eup %3444 }
 0xb36   :  { %v3447_v55 = vpop.eup %3446  ;;  %v839_v56 = vadd.f32 1.0, %v3445_v54 }
 0xb37   :  { %v840_v57 = vadd.f32 1.0, %v3447_v55 }
 0xb38   :  { %3448 = vrcp.f32 %v839_v56 }
 0xb39   :  { %3450 = vrcp.f32 %v840_v57 }
 0xb42   :  { %v3449_v58 = vpop.eup %3448 }
 0xb43   :  { %v3451_v59 = vpop.eup %3450 }
 0xb9b   :  { %v852_v61 = vpop.permute.xlu1 %851  ;;  %v850_v63 = vpop.permute.xlu0 %849 }
 0xb9c   :  { %v856_v2 = vmul.f32 %v3451_v59, %v852_v61  ;;  %v855_v3 = vmul.f32 %v3449_v58, %v850_v63 }
 0xb9e   :  { %861 = vrot.lane.b32.xlu1 %v856_v2, %s3702_s12  ;;  %859 = vrot.lane.b32.xlu0 %v855_v3, %s3702_s12 }
 0xc10   :  { %v862_v4 = vpop.permute.xlu1 %861  ;;  %v860_v5 = vpop.permute.xlu0 %859 }
 0xc11   :  { %v866_v6 = vadd.f32 %v862_v4, %v3879_v30  ;;  %v865_v7 = vadd.f32 %v860_v5, %v3881_v32 }
 0xc13   :  { %3452 = vtanh.f32 %v866_v6 }
 0xc14   :  { %3454 = vtanh.f32 %v865_v7 }
 0xc1d   :  { %v3453_v9 = vpop.eup %3452 }
 0xc1e   :  { %v3455_v11 = vpop.eup %3454  ;;  %v872_v12 = vrot.slane %v3453_v9, 1 }
 0xc1f   :  { %v871_v13 = vrot.slane %v3455_v11, 1 }
 0xc20   :  { %v876_v14 = vsub.f32 %v3953_v34, %v872_v12 }
 0xc21   :  { %v875_v15 = vsub.f32 %v3955_v36, %v871_v13 }
 0xc22   :  { %v880_v16 = vrot.slane %v876_v14, 7 }
 0xc23   :  { %v879_v17 = vrot.slane %v875_v15, 7 }
 0xc24   :  { %883 = vrot.lane.b32.xlu1 %v880_v16, %s3703_s4 }
 0xc25   :  { %881 = vrot.lane.b32.xlu0 %v879_v17, %s3703_s4 }
 0xc96   :  { %v884_v18 = vpop.permute.xlu1 %883 }
 0xc97   :  { %v888_v19 = vmul.f32 %v3451_v59, %v884_v18  ;;  %v882_v20 = vpop.permute.xlu0 %881 }
 0xc98   :  { %v887_v21 = vmul.f32 %v3449_v58, %v882_v20 }
 0xc99   :  { %893 = vrot.lane.b32.xlu1 %v888_v19, %s3704_s15 }
 0xc9a   :  { %891 = vrot.lane.b32.xlu0 %v887_v21, %s3704_s15 }
 0xd0b   :  { %v894_v23 = vpop.permute.xlu1 %893 }
 0xd0c   :  { %v3983_v24 = vadd.f32 %v3453_v9, %v894_v23  ;;  %v892_v25 = vpop.permute.xlu0 %891 }
 0xd0d   :  { %v3985_v26 = vadd.f32 %v3455_v11, %v892_v25 }
 0xd0e   :  { %v911_v27 = vrot.slane %v3983_v24, 2 }
 0xd0f   :  { %v910_v28 = vrot.slane %v3985_v26, 3 }
 0xd11   :  { %v912_v29 = vsel %vm431_vm4, %v911_v27, %v910_v28 }
 0xd12   :  { %913 = vrot.lane.b32.xlu0 %v912_v29, %s3702_s12 }
 0xd84   :  { %v914_v31 = vpop.permute.xlu0 %913 }
 0xd85   :  { %3154 = vmatmul.mubr.msk.f32.vlgmr.msra.gmra.mrb[4].mxu0 %vm274_vm5, %v914_v31 }
 0xd86   :  { %3330 = vmatpush3.bf16.msra.mxu0 %v3839_v8  ;;  %3175 = vmatprep.mubr.msk.f32.mxu0 %vm3700_vm0, %v3701_v1 }
 0xd87   :  { %3331 = vmatprep.subr.bf16.mxu0 %v3699_v0 }
 0xd8a   :  { %3333 = vmatpush3.bf16.msra.mxu0 %v3845_v10 }
 0xe58   :  { %v983_v33 = vpop.f32.mrb[4].mxu0 }
 0xe59   :  { %v1006_v35 = vadd.f32 %v983_v33, %v3865_v22  ;;  %v3155_v37 = vpop.f32.mrb[5].mxu0  ;;  %v988_v40 = vrot.slane %v983_v33, 4  ;;  %v989_v41 = vrot.slane %v983_v33, 5 }
 0xe5b   :  { %v1009_v38 = vrot.slane %v1006_v35, 5  ;;  %v1008_v39 = vrot.slane %v1006_v35, 4  ;;  %v992_v42 = vadd.f32 %v988_v40, %v3881_v32  ;;  %v993_v43 = vadd.f32 %v989_v41, %v3879_v30 }
 0xe5d   :  { %1012 = vrot.lane.b32.xlu0 %v1009_v38, %s3702_s12  ;;  %1010 = vrot.lane.b32.xlu1 %v1008_v39, %s3702_s12  ;;  %v2958_v44 = vmul.f32 -1.442695, %v992_v42  ;;  %v2959_v45 = vmul.f32 -1.442695, %v993_v43 }
 0xe5f   :  { %3456 = vpow2.f32 %v2958_v44 }
 0xe60   :  { %3458 = vpow2.f32 %v2959_v45 }
 0xe69   :  { %v3457_v48 = vpop.eup %3456 }
 0xe6a   :  { %v3459_v49 = vpop.eup %3458  ;;  %v1000_v50 = vadd.f32 1.0, %v3457_v48 }
 0xe6b   :  { %v1001_v51 = vadd.f32 1.0, %v3459_v49 }
 0xe6c   :  { %3460 = vrcp.f32 %v1000_v50 }
 0xe6d   :  { %3462 = vrcp.f32 %v1001_v51 }
 0xe76   :  { %v3461_v52 = vpop.eup %3460 }
 0xe77   :  { %v3463_v53 = vpop.eup %3462 }
 0xecf   :  { %v1013_v54 = vpop.permute.xlu0 %1012  ;;  %v1011_v55 = vpop.permute.xlu1 %1010 }
 0xed0   :  { %v1017_v56 = vmul.f32 %v3463_v53, %v1013_v54  ;;  %v1016_v57 = vmul.f32 %v3461_v52, %v1011_v55 }
 0xed2   :  { %1022 = vrot.lane.b32.xlu0 %v1017_v56, %s3702_s12  ;;  %1020 = vrot.lane.b32.xlu1 %v1016_v57, %s3702_s12 }
 0xf44   :  { %v1023_v58 = vpop.permute.xlu0 %1022  ;;  %v1021_v59 = vpop.permute.xlu1 %1020 }
 0xf45   :  { %v1027_v61 = vadd.f32 %v1023_v58, %v3879_v30  ;;  %v1026_v63 = vadd.f32 %v1021_v59, %v3881_v32 }
 0xf47   :  { %3464 = vtanh.f32 %v1027_v61 }
 0xf48   :  { %3466 = vtanh.f32 %v1026_v63 }
 0xf51   :  { %v3465_v2 = vpop.eup %3464 }
 0xf52   :  { %v3467_v3 = vpop.eup %3466  ;;  %v1033_v4 = vrot.slane %v3465_v2, 1 }
 0xf53   :  { %v1032_v5 = vrot.slane %v3467_v3, 1 }
 0xf54   :  { %v1037_v6 = vsub.f32 %v3983_v24, %v1033_v4 }
 0xf55   :  { %v1036_v7 = vsub.f32 %v3985_v26, %v1032_v5 }
 0xf56   :  { %v1041_v9 = vrot.slane %v1037_v6, 7 }
 0xf57   :  { %v1040_v11 = vrot.slane %v1036_v7, 7 }
 0xf58   :  { %1044 = vrot.lane.b32.xlu0 %v1041_v9, %s3703_s4 }
 0xf59   :  { %1042 = vrot.lane.b32.xlu1 %v1040_v11, %s3703_s4 }
 0xfca   :  { %v1045_v12 = vpop.permute.xlu0 %1044 }
 0xfcb   :  { %v1049_v13 = vmul.f32 %v3463_v53, %v1045_v12  ;;  %v1043_v14 = vpop.permute.xlu1 %1042 }
 0xfcc   :  { %v1048_v15 = vmul.f32 %v3461_v52, %v1043_v14 }
 0xfcd   :  { %1054 = vrot.lane.b32.xlu0 %v1049_v13, %s3704_s15 }
 0xfce   :  { %1052 = vrot.lane.b32.xlu1 %v1048_v15, %s3704_s15 }
0x103f   :  { %v1055_v16 = vpop.permute.xlu0 %1054 }
0x1040   :  { %v4012_v17 = vadd.f32 %v3465_v2, %v1055_v16  ;;  %v1053_v18 = vpop.permute.xlu1 %1052 }
0x1041   :  { %v4014_v19 = vadd.f32 %v3467_v3, %v1053_v18 }
0x1042   :  { %v1072_v20 = vrot.slane %v4012_v17, 3 }
0x1043   :  { %v1071_v21 = vrot.slane %v4014_v19, 4 }
0x1045   :  { %v1073_v23 = vsel %vm431_vm4, %v1072_v20, %v1071_v21 }
0x1046   :  { %1074 = vrot.lane.b32.xlu1 %v1073_v23, %s3702_s12 }
0x10b8   :  { %v1075_v25 = vpop.permute.xlu1 %1074 }
0x10b9   :  { %3165 = vmatmul.mubr.msk.f32.vlgmr.msra.gmra.mrb[8].mxu1 %vm274_vm5, %v1075_v25 }
0x10ba   :  { %3336 = vmatpush3.bf16.msra.mxu1 %v3839_v8  ;;  %3186 = vmatprep.mubr.msk.f32.mxu1 %vm3700_vm0, %v3701_v1 }
0x10bb   :  { %3337 = vmatprep.subr.bf16.mxu1 %v3699_v0 }
0x10be   :  { %3339 = vmatpush3.bf16.msra.mxu1 %v3845_v10 }
0x10bf   :  { %3348 = vmatprep.subr.bf16.mxu1 %v3699_v0 }
0x118c   :  { %v1144_v27 = vpop.f32.mrb[8].mxu1 }
0x118d   :  { %v1167_v28 = vadd.f32 %v1144_v27, %v3865_v22  ;;  %v3166_v29 = vpop.f32.mrb[9].mxu1  ;;  %v1149_v8 = vrot.slane %v1144_v27, 3  ;;  %v1150_v35 = vrot.slane %v1144_v27, 4 }
0x118f   :  { %v1170_v31 = vrot.slane %v1167_v28, 4  ;;  %v1169_v33 = vrot.slane %v1167_v28, 3  ;;  %v1153_v37 = vadd.f32 %v1149_v8, %v3881_v32  ;;  %v1154_v38 = vadd.f32 %v1150_v35, %v3879_v30 }
0x1191   :  { %1173 = vrot.lane.b32.xlu1 %v1170_v31, %s3702_s12  ;;  %1171 = vrot.lane.b32.xlu0 %v1169_v33, %s3702_s12  ;;  %v2961_v39 = vmul.f32 -1.442695, %v1153_v37  ;;  %v2962_v10 = vmul.f32 -1.442695, %v1154_v38 }
0x1193   :  { %3468 = vpow2.f32 %v2961_v39 }
0x1194   :  { %3470 = vpow2.f32 %v2962_v10 }
0x119d   :  { %v3469_v40 = vpop.eup %3468 }
0x119e   :  { %v3471_v41 = vpop.eup %3470  ;;  %v1161_v42 = vadd.f32 1.0, %v3469_v40 }
0x119f   :  { %v1162_v43 = vadd.f32 1.0, %v3471_v41 }
0x11a0   :  { %3472 = vrcp.f32 %v1161_v42 }
0x11a1   :  { %3474 = vrcp.f32 %v1162_v43 }
0x11aa   :  { %v3473_v44 = vpop.eup %3472 }
0x11ab   :  { %v3475_v45 = vpop.eup %3474 }
0x1203   :  { %v1174_v48 = vpop.permute.xlu1 %1173  ;;  %v1172_v49 = vpop.permute.xlu0 %1171 }
0x1204   :  { %v1178_v50 = vmul.f32 %v3475_v45, %v1174_v48  ;;  %v1177_v51 = vmul.f32 %v3473_v44, %v1172_v49 }
0x1206   :  { %1183 = vrot.lane.b32.xlu1 %v1178_v50, %s3702_s12  ;;  %1181 = vrot.lane.b32.xlu0 %v1177_v51, %s3702_s12 }
0x1278   :  { %v1184_v52 = vpop.permute.xlu1 %1183  ;;  %v1182_v53 = vpop.permute.xlu0 %1181 }
0x1279   :  { %v1188_v54 = vadd.f32 %v1184_v52, %v3879_v30  ;;  %v1187_v55 = vadd.f32 %v1182_v53, %v3881_v32 }
0x127b   :  { %3476 = vtanh.f32 %v1188_v54 }
0x127c   :  { %3478 = vtanh.f32 %v1187_v55 }
0x1285   :  { %v3477_v56 = vpop.eup %3476 }
0x1286   :  { %v3479_v57 = vpop.eup %3478  ;;  %v1194_v58 = vrot.slane %v3477_v56, 1 }
0x1287   :  { %v1193_v59 = vrot.slane %v3479_v57, 1 }
0x1288   :  { %v1198_v61 = vsub.f32 %v4012_v17, %v1194_v58 }
0x1289   :  { %v1197_v63 = vsub.f32 %v4014_v19, %v1193_v59 }
0x128a   :  { %v1202_v2 = vrot.slane %v1198_v61, 7 }
0x128b   :  { %v1201_v3 = vrot.slane %v1197_v63, 7 }
0x128c   :  { %1205 = vrot.lane.b32.xlu1 %v1202_v2, %s3703_s4 }
0x128d   :  { %1203 = vrot.lane.b32.xlu0 %v1201_v3, %s3703_s4 }
0x12fe   :  { %v1206_v4 = vpop.permute.xlu1 %1205 }
0x12ff   :  { %v1210_v5 = vmul.f32 %v3475_v45, %v1206_v4  ;;  %v1204_v6 = vpop.permute.xlu0 %1203 }
0x1300   :  { %v1209_v7 = vmul.f32 %v3473_v44, %v1204_v6 }
0x1301   :  { %1215 = vrot.lane.b32.xlu1 %v1210_v5, %s3704_s15 }
0x1302   :  { %1213 = vrot.lane.b32.xlu0 %v1209_v7, %s3704_s15 }
0x1373   :  { %v1216_v9 = vpop.permute.xlu1 %1215 }
0x1374   :  { %v4042_v11 = vadd.f32 %v3477_v56, %v1216_v9  ;;  %v1214_v12 = vpop.permute.xlu0 %1213 }
0x1375   :  { %v4044_v13 = vadd.f32 %v3479_v57, %v1214_v12 }
0x1376   :  { %v1233_v14 = vrot.slane %v4042_v11, 4 }
0x1377   :  { %v1232_v15 = vrot.slane %v4044_v13, 5 }
0x1379   :  { %v1234_v16 = vsel %vm431_vm4, %v1233_v14, %v1232_v15 }
0x137a   :  { %1235 = vrot.lane.b32.xlu0 %v1234_v16, %s3702_s12 }
0x13ec   :  { %v1236_v18 = vpop.permute.xlu0 %1235 }
0x13ed   :  { %3176 = vmatmul.mubr.msk.f32.vlgmr.msra.gmra.mrb[6].mxu0 %vm274_vm5, %v1236_v18 }
0x14c0   :  { %v1305_v20 = vpop.f32.mrb[6].mxu0 }
0x14c1   :  { %v1328_v21 = vadd.f32 %v1305_v20, %v3865_v22  ;;  %v3177_v23 = vpop.f32.mrb[7].mxu0  ;;  %v1310_v28 = vrot.slane %v1305_v20, 2  ;;  %v1311_v29 = vrot.slane %v1305_v20, 3 }
0x14c3   :  { %v1331_v25 = vrot.slane %v1328_v21, 3  ;;  %v1330_v27 = vrot.slane %v1328_v21, 2  ;;  %v1314_v31 = vadd.f32 %v1310_v28, %v3881_v32  ;;  %v1315_v33 = vadd.f32 %v1311_v29, %v3879_v30 }
0x14c5   :  { %1334 = vrot.lane.b32.xlu0 %v1331_v25, %s3702_s12  ;;  %1332 = vrot.lane.b32.xlu1 %v1330_v27, %s3702_s12  ;;  %v2964_v8 = vmul.f32 -1.442695, %v1314_v31  ;;  %v2965_v35 = vmul.f32 -1.442695, %v1315_v33 }
0x14c7   :  { %3480 = vpow2.f32 %v2964_v8 }
0x14c8   :  { %3482 = vpow2.f32 %v2965_v35 }
0x14d1   :  { %v3481_v37 = vpop.eup %3480 }
0x14d2   :  { %v3483_v38 = vpop.eup %3482  ;;  %v1322_v39 = vadd.f32 1.0, %v3481_v37 }
0x14d3   :  { %v1323_v10 = vadd.f32 1.0, %v3483_v38 }
0x14d4   :  { %3484 = vrcp.f32 %v1322_v39 }
0x14d5   :  { %3486 = vrcp.f32 %v1323_v10 }
0x14de   :  { %v3485_v40 = vpop.eup %3484 }
0x14df   :  { %v3487_v41 = vpop.eup %3486 }
0x1537   :  { %v1335_v42 = vpop.permute.xlu0 %1334  ;;  %v1333_v43 = vpop.permute.xlu1 %1332 }
0x1538   :  { %v1339_v44 = vmul.f32 %v3487_v41, %v1335_v42  ;;  %v1338_v45 = vmul.f32 %v3485_v40, %v1333_v43 }
0x153a   :  { %1344 = vrot.lane.b32.xlu0 %v1339_v44, %s3702_s12  ;;  %1342 = vrot.lane.b32.xlu1 %v1338_v45, %s3702_s12 }
0x15ac   :  { %v1345_v48 = vpop.permute.xlu0 %1344  ;;  %v1343_v49 = vpop.permute.xlu1 %1342 }
0x15ad   :  { %v1349_v50 = vadd.f32 %v1345_v48, %v3879_v30  ;;  %v1348_v51 = vadd.f32 %v1343_v49, %v3881_v32 }
0x15af   :  { %3488 = vtanh.f32 %v1349_v50 }
0x15b0   :  { %3490 = vtanh.f32 %v1348_v51 }
0x15b9   :  { %v3489_v52 = vpop.eup %3488 }
0x15ba   :  { %v3491_v53 = vpop.eup %3490  ;;  %v1355_v54 = vrot.slane %v3489_v52, 1 }
0x15bb   :  { %v1354_v55 = vrot.slane %v3491_v53, 1 }
0x15bc   :  { %v1359_v56 = vsub.f32 %v4042_v11, %v1355_v54 }
0x15bd   :  { %v1358_v57 = vsub.f32 %v4044_v13, %v1354_v55 }
0x15be   :  { %v1363_v58 = vrot.slane %v1359_v56, 7 }
0x15bf   :  { %v1362_v59 = vrot.slane %v1358_v57, 7 }
0x15c0   :  { %1366 = vrot.lane.b32.xlu0 %v1363_v58, %s3703_s4 }
0x15c1   :  { %1364 = vrot.lane.b32.xlu1 %v1362_v59, %s3703_s4 }
0x1632   :  { %v1367_v61 = vpop.permute.xlu0 %1366 }
0x1633   :  { %v1371_v63 = vmul.f32 %v3487_v41, %v1367_v61  ;;  %v1365_v2 = vpop.permute.xlu1 %1364 }
0x1634   :  { %v1370_v3 = vmul.f32 %v3485_v40, %v1365_v2  ;;  %v2974_v2 = vld [vmem:[%s4459_s10] ss:$0 sm:$0xff] }
0x1635   :  { %1376 = vrot.lane.b32.xlu0 %v1371_v63, %s3704_s15 }
0x1636   :  { %1374 = vrot.lane.b32.xlu1 %v1370_v3, %s3704_s15 }
0x16a7   :  { %v1377_v4 = vpop.permute.xlu0 %1376 }
0x16a8   :  { %v4066_v5 = vadd.f32 %v3489_v52, %v1377_v4  ;;  %v1375_v6 = vpop.permute.xlu1 %1374 }
0x16a9   :  { %v4068_v7 = vadd.f32 %v3491_v53, %v1375_v6 }
0x16aa   :  { %v1394_v9 = vrot.slane %v4066_v5, 5 }
0x16ab   :  { %v1393_v12 = vrot.slane %v4068_v7, 6 }
0x16ad   :  { %v1395_v14 = vsel %vm431_vm4, %v1394_v9, %v1393_v12 }
0x16ae   :  { %1396 = vrot.lane.b32.xlu1 %v1395_v14, %s3702_s12 }
0x1720   :  { %v1397_v15 = vpop.permute.xlu1 %1396 }
0x1721   :  { %3187 = vmatmul.mubr.msk.f32.vlgmr.msra.gmra.mrb[10].mxu1 %vm274_vm5, %v1397_v15 }
0x1722   :  { %3208 = vmatprep.mubr.msk.f32.mxu1 %vm3700_vm0, %v3701_v1 }
0x17f4   :  { %v1466_v16 = vpop.f32.mrb[10].mxu1 }
0x17f5   :  { %v1489_v18 = vadd.f32 %v1466_v16, %v3865_v22  ;;  %v3188_v20 = vpop.f32.mrb[11].mxu1  ;;  %v1471_v25 = vrot.slane %v1466_v16, 1  ;;  %v1472_v27 = vrot.slane %v1466_v16, 2 }
0x17f7   :  { %v1492_v21 = vrot.slane %v1489_v18, 2  ;;  %v1491_v23 = vrot.slane %v1489_v18, 1  ;;  %v1475_v28 = vadd.f32 %v1471_v25, %v3881_v32  ;;  %v1476_v29 = vadd.f32 %v1472_v27, %v3879_v30 }
0x17f9   :  { %1495 = vrot.lane.b32.xlu1 %v1492_v21, %s3702_s12  ;;  %1493 = vrot.lane.b32.xlu0 %v1491_v23, %s3702_s12  ;;  %v2967_v31 = vmul.f32 -1.442695, %v1475_v28  ;;  %v2968_v33 = vmul.f32 -1.442695, %v1476_v29 }
0x17fb   :  { %3492 = vpow2.f32 %v2967_v31 }
0x17fc   :  { %3494 = vpow2.f32 %v2968_v33 }
0x1805   :  { %v3493_v8 = vpop.eup %3492 }
0x1806   :  { %v3495_v35 = vpop.eup %3494  ;;  %v1483_v22 = vadd.f32 1.0, %v3493_v8 }
0x1807   :  { %v1484_v37 = vadd.f32 1.0, %v3495_v35 }
0x1808   :  { %3496 = vrcp.f32 %v1483_v22 }
0x1809   :  { %3498 = vrcp.f32 %v1484_v37 }
0x1812   :  { %v3497_v38 = vpop.eup %3496 }
0x1813   :  { %v3499_v39 = vpop.eup %3498 }
0x186b   :  { %v1496_v10 = vpop.permute.xlu1 %1495  ;;  %v1494_v40 = vpop.permute.xlu0 %1493 }
0x186c   :  { %v1500_v41 = vmul.f32 %v3499_v39, %v1496_v10  ;;  %v1499_v42 = vmul.f32 %v3497_v38, %v1494_v40 }
0x186e   :  { %1505 = vrot.lane.b32.xlu1 %v1500_v41, %s3702_s12  ;;  %1503 = vrot.lane.b32.xlu0 %v1499_v42, %s3702_s12 }
0x18e0   :  { %v1506_v43 = vpop.permute.xlu1 %1505  ;;  %v1504_v44 = vpop.permute.xlu0 %1503 }
0x18e1   :  { %v1510_v45 = vadd.f32 %v1506_v43, %v3879_v30  ;;  %v1509_v48 = vadd.f32 %v1504_v44, %v3881_v32 }
0x18e3   :  { %3500 = vtanh.f32 %v1510_v45 }
0x18e4   :  { %3502 = vtanh.f32 %v1509_v48 }
0x18ed   :  { %v4086_v49 = vpop.eup %3500 }
0x18ee   :  { %v3503_v50 = vpop.eup %3502  ;;  %v1516_v51 = vrot.slane %v4086_v49, 1 }
0x18ef   :  { %v1515_v52 = vrot.slane %v3503_v50, 1 }
0x18f0   :  { %v1520_v53 = vsub.f32 %v4066_v5, %v1516_v51 }
0x18f1   :  { %v1519_v54 = vsub.f32 %v4068_v7, %v1515_v52 }
0x18f2   :  { %v1524_v55 = vrot.slane %v1520_v53, 7 }
0x18f3   :  { %v1523_v56 = vrot.slane %v1519_v54, 7 }
0x18f4   :  { %1527 = vrot.lane.b32.xlu1 %v1524_v55, %s3703_s4 }
0x18f5   :  { %1525 = vrot.lane.b32.xlu0 %v1523_v56, %s3703_s4 }
0x1966   :  { %v1528_v30 = vpop.permute.xlu1 %1527 }
0x1967   :  { %v1532_v32 = vmul.f32 %v3499_v39, %v1528_v30  ;;  %v1526_v57 = vpop.permute.xlu0 %1525 }
0x1968   :  { %v1531_v58 = vmul.f32 %v3497_v38, %v1526_v57  ;;  %v2969_v38 = vld [vmem:[%s4457_s8] ss:$0 sm:$0xff]  ;;  %s3705_s8 = smov [#allocation9]  }
0x1969   :  { %1537 = vrot.lane.b32.xlu1 %v1532_v32, %s3704_s15  ;;  %s2925_s17 = sshll.u32 %s3705_s8, 4  ;;  %s2926_s17 = int_to_ptr.vmem [resolvable:$true] %s2925_s17 }
0x196a   :  { %1535 = vrot.lane.b32.xlu0 %v1531_v58, %s3704_s15  ;;  %s3666_s19 = scalar_lea.vmem %s2926_s17, 256  ;;  %p3671_p11 = scmp.lt.s32.totalorder %s2926_s17, %s2926_s17 }
0x196b   :  { %p3667_p10 = scmp.ne.s32.totalorder %s2926_s17, %s3666_s19  ;;  %p3672_p12 = scmp.lt.s32.totalorder %s3666_s19, %s3666_s19 }
0x196d   :  { %580 = vrot.lane.b32.xlu1 %v3923_v46, %s3702_s12  ;;  %v1561_v46 = vld [vmem:[#allocation8] sm:$0xff]  ;;  %p3673_p13 = por %p3672_p12, %p3671_p11 }
0x196e   :  { %421 = vrot.lane.b32.xlu0 %v3895_v62, %s3702_s12  ;;  %v1562_v62 = vld [vmem:[#allocation8 + $0x8] sm:$0xff] }
0x196f   :  { %v4111_v59 = vpack.c.bf16 %v1562_v62, %v1561_v46  ;;  %p3674_p0 = pnand %p3673_p13, %p3667_p10 }
0x1971   :  { %901 = vrot.lane.b32.xlu1 %v3985_v26, %s3702_s12  ;;  %3350 = vmatpush3.bf16.msra.mxu1 %v4111_v59  ;;  %v1564_v26 = vld [vmem:[#allocation8 + $0x18] sm:$0xff] }
0x1972   :  { %740 = vrot.lane.b32.xlu0 %v3955_v36, %s3702_s12  ;;  %v1563_v36 = vld [vmem:[#allocation8 + $0x10] sm:$0xff]  ;;  %3351 = vmatprep.subr.bf16.mxu1 %v3699_v0 }
0x1975   :  { %1223 = vrot.lane.b32.xlu1 %v4044_v13, %s3702_s12 }
0x1976   :  { %1062 = vrot.lane.b32.xlu0 %v4014_v19, %s3702_s12  ;;  %v1558_v19 = vld [vmem:[#allocation6 + $0x10] sm:$0xff] }
0x1979   :  { %582 = vrot.lane.b32.xlu1 %v3925_v47, %s3702_s12  ;;  %v4119_v47 = vpack.c.bf16 %v1564_v26, %v1563_v36 }
0x197a   :  { %1384 = vrot.lane.b32.xlu0 %v4068_v7, %s3702_s12 }
0x197b   :  { %3353 = vmatpush3.bf16.msra.mxu1 %v4119_v47 }
0x197c   :  { %3360 = vmatprep.subr.bf16.mxu1 %v3699_v0 }
0x197d   :  { %903 = vrot.lane.b32.xlu1 %v3983_v24, %s3702_s12 }
0x197e   :  { %423 = vrot.lane.b32.xlu0 %v3893_v60, %s3702_s12  ;;  %3209 = vmatmul.mubr.f32.vlgmr.msra.gmra.mrb[12].mxu1 %v3701_v1  ;;  %v1556_v60 = vld [vmem:[#allocation6] sm:$0xff] }
0x197f   :  { %3362 = vmatpush3.bf16.msra.mxu1 %v4111_v59  ;;  %3230 = vmatprep.mubr.msk.f32.mxu1 %vm3700_vm0, %v3701_v1 }
0x1980   :  { %3363 = vmatprep.subr.bf16.mxu1 %v3699_v0 }
0x1981   :  { %1225 = vrot.lane.b32.xlu1 %v4042_v11, %s3702_s12  ;;  %v1559_v11 = vld [vmem:[#allocation6 + $0x18] sm:$0xff] }
0x1982   :  { %742 = vrot.lane.b32.xlu0 %v3953_v34, %s3702_s12  ;;  %v1557_v34 = vld [vmem:[#allocation6 + $0x8] sm:$0xff]  ;;  %v3344_v13 = vpack.c.bf16 %v1559_v11, %v1558_v19 }
0x1983   :  { %3365 = vmatpush3.bf16.msra.mxu1 %v4119_v47  ;;  %v3340_v24 = vpack.c.bf16 %v1557_v34, %v1556_v60 }
0x1984   :  { %3372 = vmatprep.subr.bf16.mxu1 %v3699_v0 }
0x1985   :  { %3341 = vmatprep.subr.bf16.mxu0 %v3340_v24 }
0x1986   :  { %1064 = vrot.lane.b32.xlu0 %v4012_v17, %s3702_s12  ;;  %3343 = vmatpush3.bf16.msra.mxu0 %v3340_v24 }
0x1987   :  { %3345 = vmatprep.subr.bf16.mxu0 %v3344_v13 }
0x198a   :  { %1386 = vrot.lane.b32.xlu0 %v4066_v5, %s3702_s12  ;;  %3347 = vmatpush3.bf16.msra.mxu0 %v3344_v13 }
0x198b   :  { %3354 = vmatprep.subr.bf16.mxu0 %v3699_v0 }
0x198e   :  { %1746 = vrot.lane.b32.xlu0 %v2974_v2, %s3702_s12 }
0x19db   :  { %v1538_v61 = vpop.permute.xlu1 %1537 }
0x19dc   :  { %v1536_v17 = vpop.permute.xlu0 %1535  ;;  %v1542_v5 = vadd.f32 %v4086_v49, %v1538_v61 }
0x19dd   :  { %v1541_v63 = vadd.f32 %v3503_v50, %v1536_v17 }
0x19df   :  { %1545 = vrot.lane.b32.xlu1 %v1541_v63, %s3702_s12  ;;  %v581_v3 = vpop.permute.xlu1 %580 }
0x19e0   :  { %587 = vst.msk [vmem:[#allocation2] sm:$0x2] %vm586_vm6, %v581_v3  ;;  %v422_v4 = vpop.permute.xlu0 %421 }
0x19e1   :  { %428 = vst.msk [vmem:[#allocation2] sm:$0x1] %vm427_vm7, %v422_v4 }
0x19e3   :  { %1547 = vrot.lane.b32.xlu1 %v1542_v5, %s3702_s12  ;;  %v902_v6 = vpop.permute.xlu1 %901 }
0x19e4   :  { %908 = vst.msk [vmem:[#allocation2] sm:$0x8] %vm907_vm8, %v902_v6  ;;  %v741_v7 = vpop.permute.xlu0 %740 }
0x19e5   :  { %747 = vst.msk [vmem:[#allocation2] sm:$0x4] %vm746_vm9, %v741_v7 }
0x19e7   :  { %v1224_v9 = vpop.permute.xlu1 %1223 }
0x19e8   :  { %1230 = vst.msk [vmem:[#allocation2] sm:$0x20] %vm1229_vm10, %v1224_v9  ;;  %v1063_v12 = vpop.permute.xlu0 %1062 }
0x19e9   :  { %1069 = vst.msk [vmem:[#allocation2] sm:$0x10] %vm1068_vm11, %v1063_v12 }
0x19eb   :  { %v583_v14 = vpop.permute.xlu1 %582 }
0x19ec   :  { %588 = vst.msk [vmem:[#allocation2 + $0x8] sm:$0x2] %vm586_vm6, %v583_v14  ;;  %v1385_v15 = vpop.permute.xlu0 %1384 }
0x19ed   :  { %1391 = vst.msk [vmem:[#allocation2] sm:$0x40] %vm1390_vm12, %v1385_v15 }
0x19ef   :  { %v904_v16 = vpop.permute.xlu1 %903 }
0x19f0   :  { %909 = vst.msk [vmem:[#allocation2 + $0x8] sm:$0x8] %vm907_vm8, %v904_v16  ;;  %v424_v18 = vpop.permute.xlu0 %423 }
0x19f1   :  { %429 = vst.msk [vmem:[#allocation2 + $0x8] sm:$0x1] %vm427_vm7, %v424_v18 }
0x19f3   :  { %v1226_v20 = vpop.permute.xlu1 %1225 }
0x19f4   :  { %1231 = vst.msk [vmem:[#allocation2 + $0x8] sm:$0x20] %vm1229_vm10, %v1226_v20  ;;  %v743_v21 = vpop.permute.xlu0 %742 }
0x19f5   :  { %748 = vst.msk [vmem:[#allocation2 + $0x8] sm:$0x4] %vm746_vm9, %v743_v21 }
0x19f8   :  { %v1065_v23 = vpop.permute.xlu0 %1064 }
0x19f9   :  { %1070 = vst.msk [vmem:[#allocation2 + $0x8] sm:$0x10] %vm1068_vm11, %v1065_v23 }
0x19fc   :  { %v1387_v25 = vpop.permute.xlu0 %1386 }
0x19fd   :  { %1392 = vst.msk [vmem:[#allocation2 + $0x8] sm:$0x40] %vm1390_vm12, %v1387_v25 }
0x1a00   :  { %v4161_v29 = vpop.permute.xlu0 %1746 }
0x1a51   :  { %v1546_v27 = vpop.permute.xlu1 %1545  ;;  %v1719_v31 = vpop.f32.mrb[12].mxu1 }
0x1a52   :  { %1552 = vst.msk [vmem:[#allocation2] sm:$0x80] %vm1551_vm13, %v1546_v27  ;;  %v3210_v33 = vpop.f32.mrb[13].mxu1  ;;  %v1749_v8 = vadd.f32 %v4161_v29, %v1719_v31  ;;  %v1724_v10 = vrot.slane %v1719_v31, 1 }
0x1a54   :  { %1752 = vrot.lane.b32.xlu0 %v1749_v8, %s3702_s12  ;;  %v1751_v22 = vrot.slane %v1749_v8, 1 }
0x1a55   :  { %v1548_v28 = vpop.permute.xlu1 %1547 }
0x1a56   :  { %1553 = vst.msk [vmem:[#allocation2 + $0x8] sm:$0x80] %vm1551_vm13, %v1548_v28  ;;  %1754 = vrot.lane.b32.xlu1 %v1751_v22, %s3702_s12 }
0x1a59   :  { %v1554_v35 = vld [vmem:[#allocation2] sm:$0xff] }
0x1a5a   :  { %3197 = vmatprep.mubr.msk.f32.mxu0 %vm274_vm5, %v1554_v35 }
0x1a5d   :  { %v1555_v37 = vld [vmem:[#allocation2 + $0x8] sm:$0xff] }
0x1a5e   :  { %3198 = vmatmul.mubr.msk.f32.vlgmr.msra.gmra.mrb[8].mxu0 %vm274_vm5, %v1555_v37 }
0x1a5f   :  { %3356 = vmatpush3.bf16.msra.mxu0 %v4111_v59  ;;  %3219 = vmatprep.mubr.msk.f32.mxu0 %vm3700_vm0, %v3701_v1 }
0x1a60   :  { %3357 = vmatprep.subr.bf16.mxu0 %v3699_v0 }
0x1a63   :  { %3359 = vmatpush3.bf16.msra.mxu0 %v4119_v47 }
0x1a64   :  { %3366 = vmatprep.subr.bf16.mxu0 %v3699_v0 }
0x1ac6   :  { %v1753_v56 = vpop.permute.xlu0 %1752 }
0x1ac8   :  { %v1755_v53 = vpop.permute.xlu1 %1754 }
0x1b31   :  { %v3199_v39 = vpop.f32.mrb[8].mxu0 }
0x1b32   :  { %v4178_v40 = vadd.f32 %v3199_v39, %v2969_v38  ;;  %v1644_v41 = vpop.f32.mrb[9].mxu0 }
0x1b33   :  { %v4180_v42 = vadd.f32 %v2969_v38, %v1644_v41 }
0x1b34   :  { %v1728_v43 = vadd.f32 %v1724_v10, %v4178_v40 }
0x1b35   :  { %v1727_v44 = vadd.f32 %v1719_v31, %v4180_v42 }
0x1b36   :  { %v2973_v45 = vmul.f32 -1.442695, %v1728_v43 }
0x1b37   :  { %v2972_v48 = vmul.f32 -1.442695, %v1727_v44 }
0x1b38   :  { %3504 = vpow2.f32 %v2973_v45 }
0x1b39   :  { %3506 = vpow2.f32 %v2972_v48 }
0x1b42   :  { %v3505_v49 = vpop.eup %3504 }
0x1b43   :  { %v3507_v50 = vpop.eup %3506  ;;  %v1736_v51 = vadd.f32 1.0, %v3505_v49 }
0x1b44   :  { %v1735_v52 = vadd.f32 1.0, %v3507_v50 }
0x1b45   :  { %3508 = vrcp.f32 %v1736_v51 }
0x1b46   :  { %3510 = vrcp.f32 %v1735_v52 }
0x1b4f   :  { %v3509_v54 = vpop.eup %3508 }
0x1b50   :  { %v3511_v55 = vpop.eup %3510  ;;  %v1759_v30 = vmul.f32 %v3509_v54, %v1755_v53 }
0x1b51   :  { %v1758_v32 = vmul.f32 %v3511_v55, %v1753_v56 }
0x1b52   :  { %1764 = vrot.lane.b32.xlu1 %v1759_v30, %s3702_s12 }
0x1b53   :  { %1762 = vrot.lane.b32.xlu0 %v1758_v32, %s3702_s12 }
0x1bc4   :  { %v1765_v57 = vpop.permute.xlu1 %1764 }
0x1bc5   :  { %v1769_v58 = vadd.f32 %v1765_v57, %v4178_v40  ;;  %v1763_v46 = vpop.permute.xlu0 %1762 }
0x1bc6   :  { %v1768_v62 = vadd.f32 %v1763_v46, %v4180_v42 }
0x1bc7   :  { %3512 = vtanh.f32 %v1769_v58 }
0x1bc8   :  { %3514 = vtanh.f32 %v1768_v62 }
0x1bd1   :  { %v3513_v36 = vpop.eup %3512 }
0x1bd2   :  { %v3515_v26 = vpop.eup %3514  ;;  %v1773_v60 = vsub.f32 0.0, %v3513_v36 }
0x1bd3   :  { %v1772_v34 = vsub.f32 0.0, %v3515_v26 }
0x1bd4   :  { %1778 = vrot.lane.b32.xlu1 %v1773_v60, %s3703_s4 }
0x1bd5   :  { %1776 = vrot.lane.b32.xlu0 %v1772_v34, %s3703_s4 }
0x1c46   :  { %v1779_v24 = vpop.permute.xlu1 %1778 }
0x1c47   :  { %v1783_v19 = vmul.f32 %v3509_v54, %v1779_v24  ;;  %v1777_v11 = vpop.permute.xlu0 %1776 }
0x1c48   :  { %v1782_v13 = vmul.f32 %v3511_v55, %v1777_v11 }
0x1c49   :  { %1788 = vrot.lane.b32.xlu1 %v1783_v19, %s3704_s15 }
0x1c4a   :  { %1786 = vrot.lane.b32.xlu0 %v1782_v13, %s3704_s15 }
0x1cbb   :  { %v1789_v61 = vpop.permute.xlu1 %1788 }
0x1cbc   :  { %v4192_v17 = vadd.f32 %v3513_v36, %v1789_v61  ;;  %v1787_v63 = vpop.permute.xlu0 %1786 }
0x1cbd   :  { %v4194_v2 = vadd.f32 %v3515_v26, %v1787_v63 }
0x1cbe   :  { %v1804_v3 = vrot.slane %v4192_v17, 7 }
0x1cc0   :  { %v1805_v4 = vsel %vm431_vm4, %v1804_v3, %v4194_v2 }
0x1cc1   :  { %1806 = vrot.lane.b32.xlu1 %v1805_v4, %s3702_s12 }
0x1d33   :  { %v1807_v5 = vpop.permute.xlu1 %1806 }
0x1d34   :  { %3220 = vmatmul.mubr.msk.f32.vlgmr.msra.gmra.mrb[10].mxu0 %vm274_vm5, %v1807_v5 }
0x1d35   :  { %3368 = vmatpush3.bf16.msra.mxu0 %v4111_v59  ;;  %3241 = vmatprep.mubr.msk.f32.mxu0 %vm3700_vm0, %v3701_v1 }
0x1d36   :  { %3369 = vmatprep.subr.bf16.mxu0 %v3699_v0 }
0x1d39   :  { %3371 = vmatpush3.bf16.msra.mxu0 %v4119_v47 }
0x1d3a   :  { %3378 = vmatprep.subr.bf16.mxu0 %v3699_v0 }
0x1e07   :  { %v1876_v6 = vpop.f32.mrb[10].mxu0 }
0x1e08   :  { %v1898_v7 = vadd.f32 %v1876_v6, %v4161_v29  ;;  %v3221_v9 = vpop.f32.mrb[11].mxu0  ;;  %v1881_v14 = vrot.slane %v1876_v6, 7  ;;  %v1885_v15 = vadd.f32 %v1876_v6, %v4178_v40 }
0x1e0a   :  { %v1900_v12 = vrot.slane %v1898_v7, 7  ;;  %1903 = vrot.lane.b32.xlu1 %v1898_v7, %s3702_s12  ;;  %v1884_v16 = vadd.f32 %v1881_v14, %v4180_v42  ;;  %v2977_v18 = vmul.f32 -1.442695, %v1885_v15 }
0x1e0c   :  { %1901 = vrot.lane.b32.xlu0 %v1900_v12, %s3702_s12  ;;  %v2976_v20 = vmul.f32 -1.442695, %v1884_v16  ;;  %3516 = vpow2.f32 %v2977_v18 }
0x1e0e   :  { %3518 = vpow2.f32 %v2976_v20 }
0x1e16   :  { %v3517_v21 = vpop.eup %3516 }
0x1e17   :  { %v1893_v25 = vadd.f32 1.0, %v3517_v21 }
0x1e18   :  { %v3519_v23 = vpop.eup %3518 }
0x1e19   :  { %v1892_v27 = vadd.f32 1.0, %v3519_v23  ;;  %3520 = vrcp.f32 %v1893_v25 }
0x1e1b   :  { %3522 = vrcp.f32 %v1892_v27 }
0x1e23   :  { %v3521_v28 = vpop.eup %3520 }
0x1e25   :  { %v3523_v8 = vpop.eup %3522 }
0x1e7c   :  { %v1904_v31 = vpop.permute.xlu1 %1903 }
0x1e7d   :  { %v1908_v33 = vmul.f32 %v3521_v28, %v1904_v31 }
0x1e7e   :  { %v1902_v35 = vpop.permute.xlu0 %1901 }
0x1e7f   :  { %v1907_v22 = vmul.f32 %v3523_v8, %v1902_v35  ;;  %1913 = vrot.lane.b32.xlu1 %v1908_v33, %s3702_s12 }
0x1e81   :  { %1911 = vrot.lane.b32.xlu0 %v1907_v22, %s3702_s12 }
0x1ef1   :  { %v1914_v37 = vpop.permute.xlu1 %1913 }
0x1ef2   :  { %v1918_v38 = vadd.f32 %v1914_v37, %v4178_v40 }
0x1ef3   :  { %v1912_v39 = vpop.permute.xlu0 %1911 }
0x1ef4   :  { %3524 = vtanh.f32 %v1918_v38  ;;  %v1917_v10 = vadd.f32 %v1912_v39, %v4180_v42 }
0x1ef6   :  { %3526 = vtanh.f32 %v1917_v10 }
0x1efe   :  { %v3525_v41 = vpop.eup %3524 }
0x1eff   :  { %v1924_v43 = vrot.slane %v3525_v41, 1 }
0x1f00   :  { %v3527_v44 = vpop.eup %3526 }
0x1f01   :  { %v1928_v45 = vsub.f32 %v4192_v17, %v1924_v43  ;;  %v1923_v48 = vrot.slane %v3527_v44, 1 }
0x1f03   :  { %v1932_v49 = vrot.slane %v1928_v45, 7  ;;  %v1927_v50 = vsub.f32 %v4194_v2, %v1923_v48 }
0x1f05   :  { %1935 = vrot.lane.b32.xlu1 %v1932_v49, %s3703_s4  ;;  %v1931_v51 = vrot.slane %v1927_v50, 7 }
0x1f07   :  { %1933 = vrot.lane.b32.xlu0 %v1931_v51, %s3703_s4 }
0x1f77   :  { %v1936_v52 = vpop.permute.xlu1 %1935 }
0x1f78   :  { %v1940_v53 = vmul.f32 %v3521_v28, %v1936_v52 }
0x1f79   :  { %v1934_v54 = vpop.permute.xlu0 %1933 }
0x1f7a   :  { %v1939_v55 = vmul.f32 %v3523_v8, %v1934_v54  ;;  %1945 = vrot.lane.b32.xlu1 %v1940_v53, %s3704_s15 }
0x1f7c   :  { %1943 = vrot.lane.b32.xlu0 %v1939_v55, %s3704_s15 }
0x1fec   :  { %v1946_v56 = vpop.permute.xlu1 %1945 }
0x1fed   :  { %v4224_v57 = vadd.f32 %v3525_v41, %v1946_v56 }
0x1fee   :  { %v1944_v30 = vpop.permute.xlu0 %1943 }
0x1fef   :  { %v4222_v32 = vadd.f32 %v3527_v44, %v1944_v30 }
0x1ff1   :  { %v1961_v58 = vrot.slane %v4222_v32, 1 }
0x1ff3   :  { %v1962_v46 = vsel %vm431_vm4, %v4224_v57, %v1961_v58 }
0x1ff4   :  { %1963 = vrot.lane.b32.xlu0 %v1962_v46, %s3702_s12 }
0x2066   :  { %v1964_v62 = vpop.permute.xlu0 %1963 }
0x2067   :  { %3231 = vmatmul.mubr.msk.f32.vlgmr.msra.gmra.mrb[14].mxu1 %vm274_vm5, %v1964_v62 }
0x2068   :  { %3374 = vmatpush3.bf16.msra.mxu1 %v4111_v59  ;;  %3252 = vmatprep.mubr.msk.f32.mxu1 %vm3700_vm0, %v3701_v1 }
0x2069   :  { %3375 = vmatprep.subr.bf16.mxu1 %v3699_v0 }
0x206c   :  { %3377 = vmatpush3.bf16.msra.mxu1 %v4119_v47 }
0x206d   :  { %3384 = vmatprep.subr.bf16.mxu1 %v3699_v0 }
0x213a   :  { %v2033_v36 = vpop.f32.mrb[14].mxu1 }
0x213b   :  { %v2056_v26 = vadd.f32 %v2033_v36, %v4161_v29  ;;  %v3232_v60 = vpop.f32.mrb[15].mxu1  ;;  %v2038_v19 = vrot.slane %v2033_v36, 6  ;;  %v2039_v11 = vrot.slane %v2033_v36, 7 }
0x213d   :  { %v2058_v34 = vrot.slane %v2056_v26, 6  ;;  %v2059_v24 = vrot.slane %v2056_v26, 7  ;;  %v2042_v13 = vadd.f32 %v2038_v19, %v4180_v42  ;;  %v2043_v61 = vadd.f32 %v2039_v11, %v4178_v40 }
0x213f   :  { %2062 = vrot.lane.b32.xlu0 %v2059_v24, %s3702_s12  ;;  %2060 = vrot.lane.b32.xlu1 %v2058_v34, %s3702_s12  ;;  %v2979_v63 = vmul.f32 -1.442695, %v2042_v13  ;;  %v2980_v3 = vmul.f32 -1.442695, %v2043_v61 }
0x2141   :  { %3528 = vpow2.f32 %v2979_v63 }
0x2142   :  { %3530 = vpow2.f32 %v2980_v3 }
0x214b   :  { %v3529_v4 = vpop.eup %3528 }
0x214c   :  { %v3531_v5 = vpop.eup %3530  ;;  %v2050_v6 = vadd.f32 1.0, %v3529_v4 }
0x214d   :  { %v2051_v7 = vadd.f32 1.0, %v3531_v5 }
0x214e   :  { %3532 = vrcp.f32 %v2050_v6 }
0x214f   :  { %3534 = vrcp.f32 %v2051_v7 }
0x2158   :  { %v3533_v9 = vpop.eup %3532 }
0x2159   :  { %v3535_v12 = vpop.eup %3534 }
0x21b1   :  { %v2063_v14 = vpop.permute.xlu0 %2062  ;;  %v2061_v15 = vpop.permute.xlu1 %2060 }
0x21b2   :  { %v2067_v16 = vmul.f32 %v3535_v12, %v2063_v14  ;;  %v2066_v18 = vmul.f32 %v3533_v9, %v2061_v15 }
0x21b4   :  { %2072 = vrot.lane.b32.xlu0 %v2067_v16, %s3702_s12  ;;  %2070 = vrot.lane.b32.xlu1 %v2066_v18, %s3702_s12 }
0x2226   :  { %v2073_v20 = vpop.permute.xlu0 %2072  ;;  %v2071_v21 = vpop.permute.xlu1 %2070 }
0x2227   :  { %v2077_v23 = vadd.f32 %v2073_v20, %v4178_v40  ;;  %v2076_v25 = vadd.f32 %v2071_v21, %v4180_v42 }
0x2229   :  { %3536 = vtanh.f32 %v2077_v23 }
0x222a   :  { %3538 = vtanh.f32 %v2076_v25 }
0x2233   :  { %v3537_v27 = vpop.eup %3536 }
0x2234   :  { %v3539_v28 = vpop.eup %3538  ;;  %v2083_v31 = vrot.slane %v3537_v27, 1 }
0x2235   :  { %v2082_v33 = vrot.slane %v3539_v28, 1 }
0x2236   :  { %v2087_v8 = vsub.f32 %v4224_v57, %v2083_v31 }
0x2237   :  { %v2086_v35 = vsub.f32 %v4222_v32, %v2082_v33 }
0x2238   :  { %v2091_v22 = vrot.slane %v2087_v8, 7 }
0x2239   :  { %v2090_v37 = vrot.slane %v2086_v35, 7 }
0x223a   :  { %2094 = vrot.lane.b32.xlu0 %v2091_v22, %s3703_s4 }
0x223b   :  { %2092 = vrot.lane.b32.xlu1 %v2090_v37, %s3703_s4 }
0x22ac   :  { %v2095_v38 = vpop.permute.xlu0 %2094 }
0x22ad   :  { %v2099_v39 = vmul.f32 %v3535_v12, %v2095_v38  ;;  %v2093_v10 = vpop.permute.xlu1 %2092 }
0x22ae   :  { %v2098_v41 = vmul.f32 %v3533_v9, %v2093_v10 }
0x22af   :  { %2104 = vrot.lane.b32.xlu0 %v2099_v39, %s3704_s15 }
0x22b0   :  { %2102 = vrot.lane.b32.xlu1 %v2098_v41, %s3704_s15 }
0x2321   :  { %v2105_v43 = vpop.permute.xlu0 %2104 }
0x2322   :  { %v4252_v44 = vadd.f32 %v3537_v27, %v2105_v43  ;;  %v2103_v45 = vpop.permute.xlu1 %2102 }
0x2323   :  { %v4254_v48 = vadd.f32 %v3539_v28, %v2103_v45 }
0x2324   :  { %v2121_v49 = vrot.slane %v4252_v44, 1 }
0x2325   :  { %v2120_v50 = vrot.slane %v4254_v48, 2 }
0x2327   :  { %v2122_v51 = vsel %vm431_vm4, %v2121_v49, %v2120_v50 }
0x2328   :  { %2123 = vrot.lane.b32.xlu1 %v2122_v51, %s3702_s12 }
0x239a   :  { %v2124_v52 = vpop.permute.xlu1 %2123 }
0x239b   :  { %3242 = vmatmul.mubr.msk.f32.vlgmr.msra.gmra.mrb[12].mxu0 %vm274_vm5, %v2124_v52 }
0x239c   :  { %3380 = vmatpush3.bf16.msra.mxu0 %v4111_v59  ;;  %3263 = vmatprep.mubr.msk.f32.mxu0 %vm3700_vm0, %v3701_v1 }
0x239d   :  { %3381 = vmatprep.subr.bf16.mxu0 %v3699_v0 }
0x23a0   :  { %3383 = vmatpush3.bf16.msra.mxu0 %v4119_v47 }
0x23a1   :  { %3390 = vmatprep.subr.bf16.mxu0 %v3699_v0 }
0x246e   :  { %v2193_v53 = vpop.f32.mrb[12].mxu0 }
0x246f   :  { %v2216_v54 = vadd.f32 %v2193_v53, %v4161_v29  ;;  %v3243_v55 = vpop.f32.mrb[13].mxu0  ;;  %v2198_v58 = vrot.slane %v2193_v53, 5  ;;  %v2199_v46 = vrot.slane %v2193_v53, 6 }
0x2471   :  { %v2218_v56 = vrot.slane %v2216_v54, 5  ;;  %v2219_v30 = vrot.slane %v2216_v54, 6  ;;  %v2202_v62 = vadd.f32 %v2198_v58, %v4180_v42  ;;  %v2203_v36 = vadd.f32 %v2199_v46, %v4178_v40 }
0x2473   :  { %2222 = vrot.lane.b32.xlu1 %v2219_v30, %s3702_s12  ;;  %2220 = vrot.lane.b32.xlu0 %v2218_v56, %s3702_s12  ;;  %v2982_v26 = vmul.f32 -1.442695, %v2202_v62  ;;  %v2983_v60 = vmul.f32 -1.442695, %v2203_v36 }
0x2475   :  { %3540 = vpow2.f32 %v2982_v26 }
0x2476   :  { %3542 = vpow2.f32 %v2983_v60 }
0x247f   :  { %v3541_v34 = vpop.eup %3540 }
0x2480   :  { %v3543_v24 = vpop.eup %3542  ;;  %v2210_v19 = vadd.f32 1.0, %v3541_v34 }
0x2481   :  { %v2211_v11 = vadd.f32 1.0, %v3543_v24 }
0x2482   :  { %3544 = vrcp.f32 %v2210_v19 }
0x2483   :  { %3546 = vrcp.f32 %v2211_v11 }
0x248c   :  { %v3545_v13 = vpop.eup %3544 }
0x248d   :  { %v3547_v61 = vpop.eup %3546 }
0x24e5   :  { %v2223_v63 = vpop.permute.xlu1 %2222  ;;  %v2221_v3 = vpop.permute.xlu0 %2220 }
0x24e6   :  { %v2227_v4 = vmul.f32 %v3547_v61, %v2223_v63  ;;  %v2226_v5 = vmul.f32 %v3545_v13, %v2221_v3 }
0x24e8   :  { %2232 = vrot.lane.b32.xlu1 %v2227_v4, %s3702_s12  ;;  %2230 = vrot.lane.b32.xlu0 %v2226_v5, %s3702_s12 }
0x255a   :  { %v2233_v6 = vpop.permute.xlu1 %2232  ;;  %v2231_v7 = vpop.permute.xlu0 %2230 }
0x255b   :  { %v2237_v9 = vadd.f32 %v2233_v6, %v4178_v40  ;;  %v2236_v12 = vadd.f32 %v2231_v7, %v4180_v42 }
0x255d   :  { %3548 = vtanh.f32 %v2237_v9 }
0x255e   :  { %3550 = vtanh.f32 %v2236_v12 }
0x2567   :  { %v3549_v14 = vpop.eup %3548 }
0x2568   :  { %v3551_v15 = vpop.eup %3550  ;;  %v2243_v16 = vrot.slane %v3549_v14, 1 }
0x2569   :  { %v2242_v18 = vrot.slane %v3551_v15, 1 }
0x256a   :  { %v2247_v20 = vsub.f32 %v4252_v44, %v2243_v16 }
0x256b   :  { %v2246_v21 = vsub.f32 %v4254_v48, %v2242_v18 }
0x256c   :  { %v2251_v23 = vrot.slane %v2247_v20, 7 }
0x256d   :  { %v2250_v25 = vrot.slane %v2246_v21, 7 }
0x256e   :  { %2254 = vrot.lane.b32.xlu1 %v2251_v23, %s3703_s4 }
0x256f   :  { %2252 = vrot.lane.b32.xlu0 %v2250_v25, %s3703_s4 }
0x25e0   :  { %v2255_v27 = vpop.permute.xlu1 %2254 }
0x25e1   :  { %v2259_v28 = vmul.f32 %v3547_v61, %v2255_v27  ;;  %v2253_v31 = vpop.permute.xlu0 %2252 }
0x25e2   :  { %v2258_v33 = vmul.f32 %v3545_v13, %v2253_v31 }
0x25e3   :  { %2264 = vrot.lane.b32.xlu1 %v2259_v28, %s3704_s15 }
0x25e4   :  { %2262 = vrot.lane.b32.xlu0 %v2258_v33, %s3704_s15 }
0x2655   :  { %v2265_v8 = vpop.permute.xlu1 %2264 }
0x2656   :  { %v4282_v35 = vadd.f32 %v3549_v14, %v2265_v8  ;;  %v2263_v22 = vpop.permute.xlu0 %2262 }
0x2657   :  { %v4284_v37 = vadd.f32 %v3551_v15, %v2263_v22 }
0x2658   :  { %v2281_v38 = vrot.slane %v4282_v35, 2 }
0x2659   :  { %v2280_v39 = vrot.slane %v4284_v37, 3 }
0x265b   :  { %v2282_v10 = vsel %vm431_vm4, %v2281_v38, %v2280_v39 }
0x265c   :  { %2283 = vrot.lane.b32.xlu0 %v2282_v10, %s3702_s12 }
0x26ce   :  { %v2284_v41 = vpop.permute.xlu0 %2283 }
0x26cf   :  { %3253 = vmatmul.mubr.msk.f32.vlgmr.msra.gmra.mrb[16].mxu1 %vm274_vm5, %v2284_v41 }
0x26d0   :  { %3386 = vmatpush3.bf16.msra.mxu1 %v4111_v59  ;;  %3274 = vmatprep.mubr.msk.f32.mxu1 %vm3700_vm0, %v3701_v1 }
0x26d1   :  { %3387 = vmatprep.subr.bf16.mxu1 %v3699_v0 }
0x26d4   :  { %3389 = vmatpush3.bf16.msra.mxu1 %v4119_v47 }
0x27a2   :  { %v2353_v43 = vpop.f32.mrb[16].mxu1 }
0x27a3   :  { %v2376_v45 = vadd.f32 %v2353_v43, %v4161_v29  ;;  %v3254_v49 = vpop.f32.mrb[17].mxu1  ;;  %v2358_v52 = vrot.slane %v2353_v43, 4  ;;  %v2359_v53 = vrot.slane %v2353_v43, 5 }
0x27a5   :  { %v2378_v50 = vrot.slane %v2376_v45, 4  ;;  %v2379_v51 = vrot.slane %v2376_v45, 5  ;;  %v2362_v54 = vadd.f32 %v2358_v52, %v4180_v42  ;;  %v2363_v55 = vadd.f32 %v2359_v53, %v4178_v40 }
0x27a7   :  { %2382 = vrot.lane.b32.xlu0 %v2379_v51, %s3702_s12  ;;  %2380 = vrot.lane.b32.xlu1 %v2378_v50, %s3702_s12  ;;  %v2985_v56 = vmul.f32 -1.442695, %v2362_v54  ;;  %v2986_v30 = vmul.f32 -1.442695, %v2363_v55 }
0x27a9   :  { %3552 = vpow2.f32 %v2985_v56 }
0x27aa   :  { %3554 = vpow2.f32 %v2986_v30 }
0x27b3   :  { %v3553_v58 = vpop.eup %3552 }
0x27b4   :  { %v3555_v46 = vpop.eup %3554  ;;  %v2370_v62 = vadd.f32 1.0, %v3553_v58 }
0x27b5   :  { %v2371_v36 = vadd.f32 1.0, %v3555_v46 }
0x27b6   :  { %3556 = vrcp.f32 %v2370_v62 }
0x27b7   :  { %3558 = vrcp.f32 %v2371_v36 }
0x27c0   :  { %v3557_v26 = vpop.eup %3556 }
0x27c1   :  { %v3559_v60 = vpop.eup %3558 }
0x2819   :  { %v2383_v34 = vpop.permute.xlu0 %2382  ;;  %v2381_v24 = vpop.permute.xlu1 %2380 }
0x281a   :  { %v2387_v19 = vmul.f32 %v3559_v60, %v2383_v34  ;;  %v2386_v11 = vmul.f32 %v3557_v26, %v2381_v24 }
0x281c   :  { %2392 = vrot.lane.b32.xlu0 %v2387_v19, %s3702_s12  ;;  %2390 = vrot.lane.b32.xlu1 %v2386_v11, %s3702_s12 }
0x288e   :  { %v2393_v13 = vpop.permute.xlu0 %2392  ;;  %v2391_v61 = vpop.permute.xlu1 %2390 }
0x288f   :  { %v2397_v63 = vadd.f32 %v2393_v13, %v4178_v40  ;;  %v2396_v3 = vadd.f32 %v2391_v61, %v4180_v42 }
0x2891   :  { %3560 = vtanh.f32 %v2397_v63 }
0x2892   :  { %3562 = vtanh.f32 %v2396_v3 }
0x289b   :  { %v3561_v4 = vpop.eup %3560 }
0x289c   :  { %v3563_v5 = vpop.eup %3562  ;;  %v2403_v6 = vrot.slane %v3561_v4, 1 }
0x289d   :  { %v2402_v7 = vrot.slane %v3563_v5, 1 }
0x289e   :  { %v2407_v9 = vsub.f32 %v4282_v35, %v2403_v6 }
0x289f   :  { %v2406_v12 = vsub.f32 %v4284_v37, %v2402_v7 }
0x28a0   :  { %v2411_v14 = vrot.slane %v2407_v9, 7 }
0x28a1   :  { %v2410_v15 = vrot.slane %v2406_v12, 7 }
0x28a2   :  { %2414 = vrot.lane.b32.xlu0 %v2411_v14, %s3703_s4 }
0x28a3   :  { %2412 = vrot.lane.b32.xlu1 %v2410_v15, %s3703_s4 }
0x2914   :  { %v2415_v16 = vpop.permute.xlu0 %2414 }
0x2915   :  { %v2419_v18 = vmul.f32 %v3559_v60, %v2415_v16  ;;  %v2413_v20 = vpop.permute.xlu1 %2412 }
0x2916   :  { %v2418_v21 = vmul.f32 %v3557_v26, %v2413_v20 }
0x2917   :  { %2424 = vrot.lane.b32.xlu0 %v2419_v18, %s3704_s15 }
0x2918   :  { %2422 = vrot.lane.b32.xlu1 %v2418_v21, %s3704_s15 }
0x2989   :  { %v2425_v23 = vpop.permute.xlu0 %2424 }
0x298a   :  { %v4311_v25 = vadd.f32 %v3561_v4, %v2425_v23  ;;  %v2423_v27 = vpop.permute.xlu1 %2422 }
0x298b   :  { %v4313_v28 = vadd.f32 %v3563_v5, %v2423_v27 }
0x298c   :  { %v2441_v31 = vrot.slane %v4311_v25, 3 }
0x298d   :  { %v2440_v33 = vrot.slane %v4313_v28, 4 }
0x298f   :  { %v2442_v8 = vsel %vm431_vm4, %v2441_v31, %v2440_v33 }
0x2990   :  { %2443 = vrot.lane.b32.xlu1 %v2442_v8, %s3702_s12 }
0x2a02   :  { %v2444_v22 = vpop.permute.xlu1 %2443 }
0x2a03   :  { %3264 = vmatmul.mubr.msk.f32.vlgmr.msra.gmra.mrb[14].mxu0 %vm274_vm5, %v2444_v22 }
0x2a04   :  { %3392 = vmatpush3.bf16.msra.mxu0 %v4111_v59  ;;  %3285 = vmatprep.mubr.msk.f32.mxu0 %vm3700_vm0, %v3701_v1 }
0x2a05   :  { %3393 = vmatprep.subr.bf16.mxu0 %v3699_v0 }
0x2a08   :  { %3395 = vmatpush3.bf16.msra.mxu0 %v4119_v47 }
0x2ad6   :  { %v2513_v38 = vpop.f32.mrb[14].mxu0 }
0x2ad7   :  { %v2536_v39 = vadd.f32 %v2513_v38, %v4161_v29  ;;  %v3265_v10 = vpop.f32.mrb[15].mxu0  ;;  %v2518_v45 = vrot.slane %v2513_v38, 3  ;;  %v2519_v49 = vrot.slane %v2513_v38, 4 }
0x2ad9   :  { %v2538_v41 = vrot.slane %v2536_v39, 3  ;;  %v2539_v43 = vrot.slane %v2536_v39, 4  ;;  %v2522_v59 = vadd.f32 %v2518_v45, %v4180_v42  ;;  %v2523_v1 = vadd.f32 %v2519_v49, %v4178_v40 }
0x2adb   :  { %2542 = vrot.lane.b32.xlu1 %v2539_v43, %s3702_s12  ;;  %2540 = vrot.lane.b32.xlu0 %v2538_v41, %s3702_s12  ;;  %v2988_v50 = vmul.f32 -1.442695, %v2522_v59  ;;  %v2989_v0 = vmul.f32 -1.442695, %v2523_v1 }
0x2add   :  { %3564 = vpow2.f32 %v2988_v50 }
0x2ade   :  { %3566 = vpow2.f32 %v2989_v0 }
0x2ae7   :  { %v3565_v47 = vpop.eup %3564 }
0x2ae8   :  { %v3567_v51 = vpop.eup %3566  ;;  %v2530_v52 = vadd.f32 1.0, %v3565_v47 }
0x2ae9   :  { %v2531_v53 = vadd.f32 1.0, %v3567_v51 }
0x2aea   :  { %3568 = vrcp.f32 %v2530_v52 }
0x2aeb   :  { %3570 = vrcp.f32 %v2531_v53 }
0x2af4   :  { %v3569_v54 = vpop.eup %3568 }
0x2af5   :  { %v3571_v55 = vpop.eup %3570 }
0x2b4d   :  { %v2543_v56 = vpop.permute.xlu1 %2542  ;;  %v2541_v30 = vpop.permute.xlu0 %2540 }
0x2b4e   :  { %v2547_v58 = vmul.f32 %v3571_v55, %v2543_v56  ;;  %v2546_v46 = vmul.f32 %v3569_v54, %v2541_v30 }
0x2b50   :  { %2552 = vrot.lane.b32.xlu1 %v2547_v58, %s3702_s12  ;;  %2550 = vrot.lane.b32.xlu0 %v2546_v46, %s3702_s12 }
0x2bc2   :  { %v2553_v62 = vpop.permute.xlu1 %2552  ;;  %v2551_v36 = vpop.permute.xlu0 %2550 }
0x2bc3   :  { %v2557_v26 = vadd.f32 %v2553_v62, %v4178_v40  ;;  %v2556_v60 = vadd.f32 %v2551_v36, %v4180_v42 }
0x2bc5   :  { %3572 = vtanh.f32 %v2557_v26 }
0x2bc6   :  { %3574 = vtanh.f32 %v2556_v60 }
0x2bcf   :  { %v3573_v34 = vpop.eup %3572 }
0x2bd0   :  { %v3575_v24 = vpop.eup %3574  ;;  %v2563_v19 = vrot.slane %v3573_v34, 1 }
0x2bd1   :  { %v2562_v11 = vrot.slane %v3575_v24, 1 }
0x2bd2   :  { %v2567_v13 = vsub.f32 %v4311_v25, %v2563_v19 }
0x2bd3   :  { %v2566_v61 = vsub.f32 %v4313_v28, %v2562_v11 }
0x2bd4   :  { %v2571_v63 = vrot.slane %v2567_v13, 7 }
0x2bd5   :  { %v2570_v3 = vrot.slane %v2566_v61, 7 }
0x2bd6   :  { %2574 = vrot.lane.b32.xlu1 %v2571_v63, %s3703_s4 }
0x2bd7   :  { %2572 = vrot.lane.b32.xlu0 %v2570_v3, %s3703_s4 }
0x2c48   :  { %v2575_v4 = vpop.permute.xlu1 %2574 }
0x2c49   :  { %v2579_v5 = vmul.f32 %v3571_v55, %v2575_v4  ;;  %v2573_v6 = vpop.permute.xlu0 %2572 }
0x2c4a   :  { %v2578_v7 = vmul.f32 %v3569_v54, %v2573_v6 }
0x2c4b   :  { %2584 = vrot.lane.b32.xlu1 %v2579_v5, %s3704_s15 }
0x2c4c   :  { %2582 = vrot.lane.b32.xlu0 %v2578_v7, %s3704_s15 }
0x2cbd   :  { %v2585_v9 = vpop.permute.xlu1 %2584 }
0x2cbe   :  { %v4340_v12 = vadd.f32 %v3573_v34, %v2585_v9  ;;  %v2583_v14 = vpop.permute.xlu0 %2582 }
0x2cbf   :  { %v4342_v15 = vadd.f32 %v3575_v24, %v2583_v14 }
0x2cc0   :  { %v2601_v16 = vrot.slane %v4340_v12, 4 }
0x2cc1   :  { %v2600_v18 = vrot.slane %v4342_v15, 5 }
0x2cc3   :  { %v2602_v20 = vsel %vm431_vm4, %v2601_v16, %v2600_v18 }
0x2cc4   :  { %2603 = vrot.lane.b32.xlu0 %v2602_v20, %s3702_s12 }
0x2d36   :  { %v2604_v21 = vpop.permute.xlu0 %2603 }
0x2d37   :  { %3275 = vmatmul.mubr.msk.f32.vlgmr.msra.gmra.mrb[18].mxu1 %vm274_vm5, %v2604_v21 }
0x2e0a   :  { %v2673_v23 = vpop.f32.mrb[18].mxu1 }
0x2e0b   :  { %v2696_v27 = vadd.f32 %v2673_v23, %v4161_v29  ;;  %v3276_v31 = vpop.f32.mrb[19].mxu1  ;;  %v2678_v22 = vrot.slane %v2673_v23, 2  ;;  %v2679_v38 = vrot.slane %v2673_v23, 3 }
0x2e0d   :  { %v2698_v33 = vrot.slane %v2696_v27, 2  ;;  %v2699_v8 = vrot.slane %v2696_v27, 3  ;;  %v2682_v39 = vadd.f32 %v2678_v22, %v4180_v42  ;;  %v2683_v10 = vadd.f32 %v2679_v38, %v4178_v40 }
0x2e0f   :  { %2702 = vrot.lane.b32.xlu0 %v2699_v8, %s3702_s12  ;;  %2700 = vrot.lane.b32.xlu1 %v2698_v33, %s3702_s12  ;;  %v2991_v41 = vmul.f32 -1.442695, %v2682_v39  ;;  %v2992_v43 = vmul.f32 -1.442695, %v2683_v10 }
0x2e11   :  { %3576 = vpow2.f32 %v2991_v41 }
0x2e12   :  { %3578 = vpow2.f32 %v2992_v43 }
0x2e1b   :  { %v3577_v45 = vpop.eup %3576 }
0x2e1c   :  { %v3579_v49 = vpop.eup %3578  ;;  %v2690_v59 = vadd.f32 1.0, %v3577_v45 }
0x2e1d   :  { %v2691_v1 = vadd.f32 1.0, %v3579_v49 }
0x2e1e   :  { %3580 = vrcp.f32 %v2690_v59 }
0x2e1f   :  { %3582 = vrcp.f32 %v2691_v1 }
0x2e28   :  { %v3581_v50 = vpop.eup %3580 }
0x2e29   :  { %v3583_v0 = vpop.eup %3582 }
0x2e81   :  { %v2703_v47 = vpop.permute.xlu0 %2702  ;;  %v2701_v51 = vpop.permute.xlu1 %2700 }
0x2e82   :  { %v2707_v52 = vmul.f32 %v3583_v0, %v2703_v47  ;;  %v2706_v53 = vmul.f32 %v3581_v50, %v2701_v51 }
0x2e84   :  { %2712 = vrot.lane.b32.xlu0 %v2707_v52, %s3702_s12  ;;  %2710 = vrot.lane.b32.xlu1 %v2706_v53, %s3702_s12 }
0x2ef6   :  { %v2713_v54 = vpop.permute.xlu0 %2712  ;;  %v2711_v55 = vpop.permute.xlu1 %2710 }
0x2ef7   :  { %v2717_v56 = vadd.f32 %v2713_v54, %v4178_v40  ;;  %v2716_v30 = vadd.f32 %v2711_v55, %v4180_v42 }
0x2ef9   :  { %3584 = vtanh.f32 %v2717_v56 }
0x2efa   :  { %3586 = vtanh.f32 %v2716_v30 }
0x2f03   :  { %v3585_v58 = vpop.eup %3584 }
0x2f04   :  { %v3587_v46 = vpop.eup %3586  ;;  %v2723_v62 = vrot.slane %v3585_v58, 1 }
0x2f05   :  { %v2722_v36 = vrot.slane %v3587_v46, 1 }
0x2f06   :  { %v2727_v26 = vsub.f32 %v4340_v12, %v2723_v62 }
0x2f07   :  { %v2726_v60 = vsub.f32 %v4342_v15, %v2722_v36 }
0x2f08   :  { %v2731_v34 = vrot.slane %v2727_v26, 7 }
0x2f09   :  { %v2730_v24 = vrot.slane %v2726_v60, 7 }
0x2f0a   :  { %2734 = vrot.lane.b32.xlu0 %v2731_v34, %s3703_s4 }
0x2f0b   :  { %2732 = vrot.lane.b32.xlu1 %v2730_v24, %s3703_s4 }
0x2f7c   :  { %v2735_v19 = vpop.permute.xlu0 %2734 }
0x2f7d   :  { %v2739_v11 = vmul.f32 %v3583_v0, %v2735_v19  ;;  %v2733_v13 = vpop.permute.xlu1 %2732 }
0x2f7e   :  { %v2738_v61 = vmul.f32 %v3581_v50, %v2733_v13 }
0x2f7f   :  { %2744 = vrot.lane.b32.xlu0 %v2739_v11, %s3704_s15 }
0x2f80   :  { %2742 = vrot.lane.b32.xlu1 %v2738_v61, %s3704_s15 }
0x2ff1   :  { %v2745_v63 = vpop.permute.xlu0 %2744 }
0x2ff2   :  { %v4364_v3 = vadd.f32 %v3585_v58, %v2745_v63  ;;  %v2743_v4 = vpop.permute.xlu1 %2742 }
0x2ff3   :  { %v4366_v5 = vadd.f32 %v3587_v46, %v2743_v4 }
0x2ff4   :  { %v2761_v6 = vrot.slane %v4364_v3, 5 }
0x2ff5   :  { %v2760_v7 = vrot.slane %v4366_v5, 6 }
0x2ff7   :  { %v2762_v9 = vsel %vm431_vm4, %v2761_v6, %v2760_v7 }
0x2ff8   :  { %2763 = vrot.lane.b32.xlu1 %v2762_v9, %s3702_s12 }
0x306a   :  { %v2764_v14 = vpop.permute.xlu1 %2763 }
0x306b   :  { %3286 = vmatmul.mubr.msk.f32.vlgmr.msra.gmra.mrb[16].mxu0 %vm274_vm5, %v2764_v14 }
0x313e   :  { %v2833_v16 = vpop.f32.mrb[16].mxu0 }
0x313f   :  { %v2856_v18 = vadd.f32 %v2833_v16, %v4161_v29  ;;  %v3287_v20 = vpop.f32.mrb[17].mxu0  ;;  %v2838_v27 = vrot.slane %v2833_v16, 1  ;;  %v2839_v31 = vrot.slane %v2833_v16, 2 }
0x3141   :  { %v2858_v21 = vrot.slane %v2856_v18, 1  ;;  %v2859_v23 = vrot.slane %v2856_v18, 2  ;;  %v2842_v33 = vadd.f32 %v2838_v27, %v4180_v42  ;;  %v2843_v8 = vadd.f32 %v2839_v31, %v4178_v40 }
0x3143   :  { %2862 = vrot.lane.b32.xlu1 %v2859_v23, %s3702_s12  ;;  %2860 = vrot.lane.b32.xlu0 %v2858_v21, %s3702_s12  ;;  %v2994_v22 = vmul.f32 -1.442695, %v2842_v33  ;;  %v2995_v38 = vmul.f32 -1.442695, %v2843_v8 }
0x3145   :  { %3588 = vpow2.f32 %v2994_v22 }
0x3146   :  { %3590 = vpow2.f32 %v2995_v38 }
0x314f   :  { %v3589_v39 = vpop.eup %3588 }
0x3150   :  { %v3591_v10 = vpop.eup %3590  ;;  %v2850_v29 = vadd.f32 1.0, %v3589_v39 }
0x3151   :  { %v2851_v41 = vadd.f32 1.0, %v3591_v10 }
0x3152   :  { %3592 = vrcp.f32 %v2850_v29 }
0x3153   :  { %3594 = vrcp.f32 %v2851_v41 }
0x315c   :  { %v3593_v43 = vpop.eup %3592 }
0x315d   :  { %v3595_v45 = vpop.eup %3594 }
0x31b5   :  { %v2863_v49 = vpop.permute.xlu1 %2862  ;;  %v2861_v59 = vpop.permute.xlu0 %2860 }
0x31b6   :  { %v2867_v1 = vmul.f32 %v3595_v45, %v2863_v49  ;;  %v2866_v50 = vmul.f32 %v3593_v43, %v2861_v59 }
0x31b8   :  { %2872 = vrot.lane.b32.xlu1 %v2867_v1, %s3702_s12  ;;  %2870 = vrot.lane.b32.xlu0 %v2866_v50, %s3702_s12 }
0x322a   :  { %v2873_v0 = vpop.permute.xlu1 %2872  ;;  %v2871_v47 = vpop.permute.xlu0 %2870 }
0x322b   :  { %v2877_v51 = vadd.f32 %v2873_v0, %v4178_v40  ;;  %v2876_v52 = vadd.f32 %v2871_v47, %v4180_v42 }
0x322d   :  { %3596 = vtanh.f32 %v2877_v51 }
0x322e   :  { %3598 = vtanh.f32 %v2876_v52 }
0x3237   :  { %v3597_v53 = vpop.eup %3596 }
0x3238   :  { %v3599_v54 = vpop.eup %3598  ;;  %v2883_v55 = vrot.slane %v3597_v53, 1 }
0x3239   :  { %v2882_v56 = vrot.slane %v3599_v54, 1 }
0x323a   :  { %v2887_v30 = vsub.f32 %v4364_v3, %v2883_v55 }
0x323b   :  { %v2886_v58 = vsub.f32 %v4366_v5, %v2882_v56 }
0x323c   :  { %v2891_v46 = vrot.slane %v2887_v30, 7 }
0x323d   :  { %v2890_v62 = vrot.slane %v2886_v58, 7 }
0x323e   :  { %2894 = vrot.lane.b32.xlu1 %v2891_v46, %s3703_s4 }
0x323f   :  { %2892 = vrot.lane.b32.xlu0 %v2890_v62, %s3703_s4 }
0x32b0   :  { %v2895_v36 = vpop.permute.xlu1 %2894 }
0x32b1   :  { %v2899_v40 = vmul.f32 %v3595_v45, %v2895_v36  ;;  %v2893_v26 = vpop.permute.xlu0 %2892 }
0x32b2   :  { %v2898_v42 = vmul.f32 %v3593_v43, %v2893_v26 }
0x32b3   :  { %2904 = vrot.lane.b32.xlu1 %v2899_v40, %s3704_s15 }
0x32b4   :  { %2902 = vrot.lane.b32.xlu0 %v2898_v42, %s3704_s15 }
0x32b7   :  { %1798 = vrot.lane.b32.xlu1 %v4192_v17, %s3702_s12 }
0x32b8   :  { %1796 = vrot.lane.b32.xlu0 %v4194_v2, %s3702_s12 }
0x32bb   :  { %1955 = vrot.lane.b32.xlu1 %v4224_v57, %s3702_s12 }
0x32bc   :  { %1953 = vrot.lane.b32.xlu0 %v4222_v32, %s3702_s12 }
0x32bf   :  { %2114 = vrot.lane.b32.xlu1 %v4252_v44, %s3702_s12 }
0x32c0   :  { %2112 = vrot.lane.b32.xlu0 %v4254_v48, %s3702_s12 }
0x32c3   :  { %2274 = vrot.lane.b32.xlu1 %v4282_v35, %s3702_s12 }
0x32c4   :  { %2272 = vrot.lane.b32.xlu0 %v4284_v37, %s3702_s12 }
0x32c7   :  { %2434 = vrot.lane.b32.xlu1 %v4311_v25, %s3702_s12 }
0x32c8   :  { %2432 = vrot.lane.b32.xlu0 %v4313_v28, %s3702_s12 }
0x32cb   :  { %2594 = vrot.lane.b32.xlu1 %v4340_v12, %s3702_s12 }
0x32cc   :  { %2592 = vrot.lane.b32.xlu0 %v4342_v15, %s3702_s12 }
0x32cf   :  { %2754 = vrot.lane.b32.xlu1 %v4364_v3, %s3702_s12 }
0x32d0   :  { %2752 = vrot.lane.b32.xlu0 %v4366_v5, %s3702_s12 }
0x3325   :  { %v2905_v17 = vpop.permute.xlu1 %2904 }
0x3326   :  { %v2909_v2 = vadd.f32 %v3597_v53, %v2905_v17  ;;  %v2903_v32 = vpop.permute.xlu0 %2902 }
0x3327   :  { %v2908_v57 = vadd.f32 %v3599_v54, %v2903_v32 }
0x3328   :  { %2914 = vrot.lane.b32.xlu1 %v2909_v2, %s3702_s12 }
0x3329   :  { %2912 = vrot.lane.b32.xlu0 %v2908_v57, %s3702_s12  ;;  %v1799_v44 = vpop.permute.xlu1 %1798 }
0x332a   :  { %1803 = vst.msk [vmem:[#allocation9 + $0x8] sm:$0x1] %vm427_vm7, %v1799_v44  ;;  %v1797_v48 = vpop.permute.xlu0 %1796 }
0x332b   :  { %1802 = vst.msk [vmem:[#allocation9] sm:$0x1] %vm427_vm7, %v1797_v48 }
0x332d   :  { %v1956_v35 = vpop.permute.xlu1 %1955 }
0x332e   :  { %1960 = vst.msk [vmem:[#allocation9 + $0x8] sm:$0x2] %vm586_vm6, %v1956_v35  ;;  %v1954_v37 = vpop.permute.xlu0 %1953 }
0x332f   :  { %1959 = vst.msk [vmem:[#allocation9] sm:$0x2] %vm586_vm6, %v1954_v37 }
0x3331   :  { %v2115_v25 = vpop.permute.xlu1 %2114 }
0x3332   :  { %2119 = vst.msk [vmem:[#allocation9 + $0x8] sm:$0x4] %vm746_vm9, %v2115_v25  ;;  %v2113_v28 = vpop.permute.xlu0 %2112 }
0x3333   :  { %2118 = vst.msk [vmem:[#allocation9] sm:$0x4] %vm746_vm9, %v2113_v28 }
0x3335   :  { %v2275_v12 = vpop.permute.xlu1 %2274 }
0x3336   :  { %2279 = vst.msk [vmem:[#allocation9 + $0x8] sm:$0x8] %vm907_vm8, %v2275_v12  ;;  %v2273_v15 = vpop.permute.xlu0 %2272 }
0x3337   :  { %2278 = vst.msk [vmem:[#allocation9] sm:$0x8] %vm907_vm8, %v2273_v15 }
0x3339   :  { %v2435_v60 = vpop.permute.xlu1 %2434 }
0x333a   :  { %2439 = vst.msk [vmem:[#allocation9 + $0x8] sm:$0x10] %vm1068_vm11, %v2435_v60  ;;  %v2433_v34 = vpop.permute.xlu0 %2432 }
0x333b   :  { %2438 = vst.msk [vmem:[#allocation9] sm:$0x10] %vm1068_vm11, %v2433_v34 }
0x333d   :  { %v2595_v24 = vpop.permute.xlu1 %2594 }
0x333e   :  { %2599 = vst.msk [vmem:[#allocation9 + $0x8] sm:$0x20] %vm1229_vm10, %v2595_v24  ;;  %v2593_v19 = vpop.permute.xlu0 %2592 }
0x333f   :  { %2598 = vst.msk [vmem:[#allocation9] sm:$0x20] %vm1229_vm10, %v2593_v19 }
0x3341   :  { %v2755_v11 = vpop.permute.xlu1 %2754 }
0x3342   :  { %2759 = vst.msk [vmem:[#allocation9 + $0x8] sm:$0x40] %vm1390_vm12, %v2755_v11  ;;  %v2753_v13 = vpop.permute.xlu0 %2752 }
0x3343   :  { %2758 = vst.msk [vmem:[#allocation9] sm:$0x40] %vm1390_vm12, %v2753_v13 }
0x339a   :  { %v2915_v61 = vpop.permute.xlu1 %2914 }
0x339b   :  { %2919 = vst.msk [vmem:[#allocation9 + $0x8] sm:$0x80] %vm1551_vm13, %v2915_v61  ;;  %v2913_v63 = vpop.permute.xlu0 %2912 }
0x339c   :  { %2918 = vst.msk [vmem:[#allocation9] sm:$0x80] %vm1551_vm13, %v2913_v63 }
0x339d   :  { %3677 = shalt.err (!%p3674_p0)
}
0x339e   :  { %s3678_s22 = scalar_lea.hbm %s4460_s11, 256 }
0x339f   :  { %p3679_p1 = scmp.ne.s32.totalorder %s4460_s11, %s3678_s22  ;;  %p3682_p2 = scmp.lt.u32.totalorder %s3678_s22, %s4460_s11 }
0x33a1   :  { %p3684_p3 = pnand %p3682_p2, %p3679_p1 }
0x33a3   :  { %3687 = shalt.err (!%p3684_p3)
}
0x33a4   :  { %2931 = dma.vmem_to_hbm [thread:$0]  %s2926_s17, 256, %s4460_s11, [#allocation5], %s3696_s29, %s3696_s29, %s3697_s30  }
0x33a5   :  { %3692 = dma.done.wait [#allocation5], 256  }
0x33a6   :  { %3693 = vsyncadd [#allocation5], 4294967040 }
0x33a7   :  { %2935 = vsyncpa [#allocation4], 1 }
0x33a8   :  { %2936 = vsyncpa [#allocation7], 1 }
0x33a9   :  { %2937 = vsyncpa [#allocation5], 1 }

</bundles_post_ra>
